<compile_context>
chip_gen: v7x
topology: tpu7x:2x2x1
jax: 0.10.0
libtpu: 0.0.40
codegen_flags: <defaults>
</compile_context>

<pallas_src>
import functools

import jax
import jax.numpy as jnp
from jax import lax
from jax.experimental import pallas as pl
from jax.experimental.pallas import tpu as pltpu


def _round_up(x, m):
    return (x + m - 1) // m * m


def _bert_cnn_kernel(x_ref, w_all_ref, feat_b_ref, fc1_w_ref, fc1_b_ref,
                     fc_w_ref, fc_b_ref, out_ref, *, filter_sizes, f_pad):
    tb, s, h = x_ref.shape
    rows = tb * s

    # Single lane-dense MXU matmul covering every tap of every filter size.
    x2d = x_ref[...].reshape(rows, h)
    y = jnp.dot(x2d, w_all_ref[...], preferred_element_type=jnp.float32)

    neg = jnp.float32(-1e30)
    pooled = []
    col = 0
    for k in filter_sizes:
        # Tap 0 initializes the accumulator (no zeros + add).
        acc = y[:, col:col + f_pad]
        for j in range(1, k):
            tap = y[:, col + j * f_pad:col + (j + 1) * f_pad]
            # acc[t] += tap[t + j]; wrapped rows land on masked positions.
            acc = acc + pltpu.roll(tap, shift=rows - j, axis=0)
        col += k * f_pad

        acc3 = acc.reshape(tb, s, f_pad)
        t_idx = lax.broadcasted_iota(jnp.int32, (tb, s, f_pad), 1)
        acc3 = jnp.where(t_idx <= s - k, acc3, neg)   # mask t >= S - k + 1
        pooled.append(jnp.max(acc3, axis=1))          # max_pool1d -> [tb, f_pad]

    # Bias + ReLU hoisted past the max-pool (bias is time-invariant).
    feat = jnp.concatenate(pooled, axis=1)            # [tb, nk*f_pad]
    feat = jnp.maximum(feat + feat_b_ref[...], 0.0)

    h1 = jnp.dot(feat, fc1_w_ref[...],
                 preferred_element_type=jnp.float32) + fc1_b_ref[...]
    h1 = jnp.maximum(h1, 0.0)                         # ReLU (dropout = identity)
    out = jnp.dot(h1, fc_w_ref[...],
                  preferred_element_type=jnp.float32) + fc_b_ref[...]
    out_ref[...] = out.astype(out_ref.dtype)


def bert_cnn_forward(encoder_out, conv_params, fc1_w, fc1_b, fc_w, fc_b,
                     filter_sizes, block_b=8):
    """encoder_out: [B, S, H]. Returns logits [B, num_classes]."""
    B, S, H = encoder_out.shape
    nk = len(filter_sizes)
    F = conv_params[0][0].shape[-1]
    num_classes = fc_w.shape[1]
    fc1_dim = fc1_w.shape[1]
    dtype = encoder_out.dtype

    F_pad = _round_up(F, 128)
    C_pad = _round_up(num_classes, 128)

    # --- Pack conv weights into one lane-dense slab, tap-major per filter. ---
    w_slabs, b_parts = [], []
    for (w, b), k in zip(conv_params, filter_sizes):
        wp = jnp.zeros((k, H, F_pad), w.dtype).at[:, :, :F].set(w)
        w_slabs.append(jnp.transpose(wp, (1, 0, 2)).reshape(H, k * F_pad))
        b_parts.append(jnp.zeros((F_pad,), jnp.float32).at[:F].set(
            b.astype(jnp.float32)))
    w_all = jnp.concatenate(w_slabs, axis=1).astype(dtype)     # [H, sum(k)*F_pad]
    feat_b = jnp.concatenate(b_parts).reshape(1, nk * F_pad)   # [1, nk*F_pad]

    # --- Remap fc1 weight to the padded feature layout. ---
    fc1_w_pad = jnp.zeros((nk * F_pad, fc1_dim), fc1_w.dtype)
    for i in range(nk):
        fc1_w_pad = fc1_w_pad.at[i * F_pad:i * F_pad + F, :].set(
            fc1_w[i * F:(i + 1) * F, :])
    fc1_w_pad = fc1_w_pad.astype(dtype)
    fc1_b2 = fc1_b.reshape(1, fc1_dim).astype(jnp.float32)

    # --- Pad final fc to 128 output lanes (lane-dense store). ---
    fc_w_pad = jnp.zeros((fc1_dim, C_pad), fc_w.dtype).at[:, :num_classes].set(
        fc_w).astype(dtype)
    fc_b_pad = jnp.zeros((1, C_pad), jnp.float32).at[0, :num_classes].set(
        fc_b.astype(jnp.float32))

    # --- Batch tiling (sublane-friendly block sizes). ---
    if B <= block_b:
        TB = B                       # single block == full dim, always legal
    else:
        TB = max(8, (block_b // 8) * 8)
    B_pad = _round_up(B, TB)
    x = encoder_out
    if B_pad != B:
        x = jnp.pad(x, ((0, B_pad - B), (0, 0), (0, 0)))
    grid = (B_pad // TB,)

    total_cols = sum(filter_sizes) * F_pad
    cost = pl.CostEstimate(
        flops=2 * B_pad * S * H * total_cols
              + 2 * B_pad * nk * F_pad * fc1_dim
              + 2 * B_pad * fc1_dim * C_pad,
        transcendentals=0,
        bytes_accessed=(x.size + w_all.size + fc1_w_pad.size + fc_w_pad.size)
                       * x.dtype.itemsize + B_pad * C_pad * 4,
    )

    kernel = functools.partial(_bert_cnn_kernel,
                               filter_sizes=tuple(filter_sizes), f_pad=F_pad)

    out = pl.pallas_call(
        kernel,
        grid=grid,
        in_specs=[
            pl.BlockSpec((TB, S, H), lambda i: (i, 0, 0)),
            pl.BlockSpec(w_all.shape, lambda i: (0, 0)),
            pl.BlockSpec(feat_b.shape, lambda i: (0, 0)),
            pl.BlockSpec(fc1_w_pad.shape, lambda i: (0, 0)),
            pl.BlockSpec(fc1_b2.shape, lambda i: (0, 0)),
            pl.BlockSpec(fc_w_pad.shape, lambda i: (0, 0)),
            pl.BlockSpec(fc_b_pad.shape, lambda i: (0, 0)),
        ],
        out_specs=pl.BlockSpec((TB, C_pad), lambda i: (i, 0)),
        out_shape=jax.ShapeDtypeStruct((B_pad, C_pad), jnp.float32),
        compiler_params=pltpu.CompilerParams(
            dimension_semantics=("parallel",)),
        cost_estimate=cost,
    )(x, w_all, feat_b, fc1_w_pad, fc1_b2, fc_w_pad, fc_b_pad)

    return out[:B, :num_classes]


def reference_forward(encoder_out, conv_params, fc1_w, fc1_b, fc_w, fc_b,
                      filter_sizes):
    """Pure-JAX reference mirroring the PyTorch module (eval mode)."""
    B, S, H = encoder_out.shape
    pooled = []
    for (w, b), k in zip(conv_params, filter_sizes):
        t_len = S - k + 1
        acc = jnp.zeros((B, t_len, w.shape[2]), jnp.float32)
        for j in range(k):
            acc = acc + jnp.einsum("bth,hf->btf",
                                   encoder_out[:, j:j + t_len, :], w[j])
        acc = jax.nn.relu(acc + b[None, None, :])
        pooled.append(jnp.max(acc, axis=1))
    feat = jnp.concatenate(pooled, axis=1)
    h = jax.nn.relu(feat @ fc1_w + fc1_b)
    return h @ fc_w + fc_b


if __name__ == "__main__":
    # Small, forward-consistent shapes (batch sized so the grid has >1 step).
    batch = 16
    seq = 8
    hidden_size = 32
    num_filters = 8
    filter_sizes = (2, 3, 4)
    num_classes = 4
    fc1_dim = 512
    vocab = 100

    key = jax.random.PRNGKey(0)
    keys = jax.random.split(key, 16)

    # "BERT": deterministic embedding table; tokens -> encoder_out [B, S, H].
    tokens = jax.random.randint(keys[0], (batch, seq), 0, vocab)
    emb_table = 0.1 * jax.random.normal(keys[1], (vocab, hidden_size),
                                        jnp.float32)
    encoder_out = emb_table[tokens]                     # [B, S, H]

    # Conv2d(1, num_filters, (k, hidden_size)) params, stored as [k, H, F].
    conv_params = []
    for i, k in enumerate(filter_sizes):
        w = 0.1 * jax.random.normal(keys[2 + 2 * i],
                                    (k, hidden_size, num_filters), jnp.float32)
        b = 0.1 * jax.random.normal(keys[3 + 2 * i], (num_filters,),
                                    jnp.float32)
        conv_params.append((w, b))

    fc1_w = 0.05 * jax.random.normal(
        keys[10], (num_filters * len(filter_sizes), fc1_dim), jnp.float32)
    fc1_b = 0.05 * jax.random.normal(keys[11], (fc1_dim,), jnp.float32)
    fc_w = 0.05 * jax.random.normal(keys[12], (fc1_dim, num_classes),
                                    jnp.float32)
    fc_b = 0.05 * jax.random.normal(keys[13], (num_classes,), jnp.float32)

    out = bert_cnn_forward(encoder_out, conv_params, fc1_w, fc1_b, fc_w, fc_b,
                           filter_sizes, block_b=8)
    out = jax.block_until_ready(out)

    ref = reference_forward(encoder_out, conv_params, fc1_w, fc1_b, fc_w, fc_b,
                            filter_sizes)
    assert out.shape == (batch, num_classes)
    assert jnp.allclose(out, ref, atol=2e-3, rtol=2e-3), (out, ref)

    print("KERNEL_OK")
</pallas_src>

<mosaic_0001>
module attributes {stable_mosaic.version = 11 : i64} {
  func.func @_bert_cnn_kernel(%arg0: i32, %arg1: memref<8x8x32xf32, #tpu.memory_space<vmem>>, %arg2: memref<32x1152xf32, #tpu.memory_space<vmem>>, %arg3: memref<1x384xf32, #tpu.memory_space<vmem>>, %arg4: memref<384x512xf32, #tpu.memory_space<vmem>>, %arg5: memref<1x512xf32, #tpu.memory_space<vmem>>, %arg6: memref<512x128xf32, #tpu.memory_space<vmem>>, %arg7: memref<1x128xf32, #tpu.memory_space<vmem>>, %arg8: memref<8x128xf32, #tpu.memory_space<vmem>>) attributes {dimension_semantics = [#tpu.dimension_semantics<parallel>], iteration_bounds = array<i64: 2>, scalar_prefetch = 0 : i64, scratch_operands = 0 : i64, tpu.core_type = #tpu.core_type<tc>, window_params = [{transform_indices = @transform_0, window_bounds = array<i64: 8, 8, 32>}, {pipeline_mode = #tpu.pipeline_mode<synchronous>, transform_indices = @transform_1, window_bounds = array<i64: 32, 1152>}, {pipeline_mode = #tpu.pipeline_mode<synchronous>, transform_indices = @transform_2, window_bounds = array<i64: 1, 384>}, {pipeline_mode = #tpu.pipeline_mode<synchronous>, transform_indices = @transform_3, window_bounds = array<i64: 384, 512>}, {pipeline_mode = #tpu.pipeline_mode<synchronous>, transform_indices = @transform_4, window_bounds = array<i64: 1, 512>}, {pipeline_mode = #tpu.pipeline_mode<synchronous>, transform_indices = @transform_5, window_bounds = array<i64: 512, 128>}, {pipeline_mode = #tpu.pipeline_mode<synchronous>, transform_indices = @transform_6, window_bounds = array<i64: 1, 128>}, {transform_indices = @transform_7, window_bounds = array<i64: 8, 128>}]} {
    %c0 = arith.constant 0 : index
    %c0_0 = arith.constant 0 : index
    %c0_1 = arith.constant 0 : index
    %0 = vector.load %arg1[%c0, %c0_0, %c0_1] : memref<8x8x32xf32, #tpu.memory_space<vmem>>, vector<8x8x32xf32>
    %1 = vector.shape_cast %0 : vector<8x8x32xf32> to vector<64x32xf32>
    %c0_2 = arith.constant 0 : index
    %c0_3 = arith.constant 0 : index
    %2 = vector.load %arg2[%c0_2, %c0_3] : memref<32x1152xf32, #tpu.memory_space<vmem>>, vector<32x1152xf32>
    %cst = arith.constant dense<0.000000e+00> : vector<64x1152xf32>
    %3 = tpu.matmul %1, %2, %cst {dimension_numbers = #tpu.dot_dimension_numbers<[1], [0], [0], [1], [0, 0, 1, 1], [], []>} : vector<64x32xf32>, vector<32x1152xf32>, vector<64x1152xf32> -> vector<64x1152xf32>
    %4 = vector.extract_strided_slice %3 {offsets = [0, 0], sizes = [64, 128], strides = [1, 1]} : vector<64x1152xf32> to vector<64x128xf32>
    %5 = vector.extract_strided_slice %3 {offsets = [0, 128], sizes = [64, 128], strides = [1, 1]} : vector<64x1152xf32> to vector<64x128xf32>
    %c63_i32 = arith.constant 63 : i32
    %6 = tpu.dynamic_rotate %5 by %c63_i32 dim 0 : vector<64x128xf32>, i32 -> vector<64x128xf32>
    %7 = arith.addf %4, %6 : vector<64x128xf32>
    %8 = vector.shape_cast %7 : vector<64x128xf32> to vector<8x8x128xf32>
    %9 = tpu.iota {dimensions = array<i32: 1>} : vector<8x8x128xi32>
    %c6_i32 = arith.constant 6 : i32
    %10 = vector.broadcast %c6_i32 : i32 to vector<8x8x128xi32>
    %11 = arith.cmpi sle, %9, %10 : vector<8x8x128xi32>
    %cst_4 = arith.constant -1.000000e+30 : f32
    %12 = vector.broadcast %cst_4 : f32 to vector<8x8x128xf32>
    %13 = arith.select %11, %8, %12 : vector<8x8x128xi1>, vector<8x8x128xf32>
    %cst_5 = arith.constant dense<0xFF800000> : vector<8x128xf32>
    %14 = vector.multi_reduction <maximumf>, %13, %cst_5 [1] : vector<8x8x128xf32> to vector<8x128xf32>
    %15 = vector.extract_strided_slice %3 {offsets = [0, 256], sizes = [64, 128], strides = [1, 1]} : vector<64x1152xf32> to vector<64x128xf32>
    %16 = vector.extract_strided_slice %3 {offsets = [0, 384], sizes = [64, 128], strides = [1, 1]} : vector<64x1152xf32> to vector<64x128xf32>
    %c63_i32_6 = arith.constant 63 : i32
    %17 = tpu.dynamic_rotate %16 by %c63_i32_6 dim 0 : vector<64x128xf32>, i32 -> vector<64x128xf32>
    %18 = arith.addf %15, %17 : vector<64x128xf32>
    %19 = vector.extract_strided_slice %3 {offsets = [0, 512], sizes = [64, 128], strides = [1, 1]} : vector<64x1152xf32> to vector<64x128xf32>
    %c62_i32 = arith.constant 62 : i32
    %20 = tpu.dynamic_rotate %19 by %c62_i32 dim 0 : vector<64x128xf32>, i32 -> vector<64x128xf32>
    %21 = arith.addf %18, %20 : vector<64x128xf32>
    %22 = vector.shape_cast %21 : vector<64x128xf32> to vector<8x8x128xf32>
    %23 = tpu.iota {dimensions = array<i32: 1>} : vector<8x8x128xi32>
    %c5_i32 = arith.constant 5 : i32
    %24 = vector.broadcast %c5_i32 : i32 to vector<8x8x128xi32>
    %25 = arith.cmpi sle, %23, %24 : vector<8x8x128xi32>
    %cst_7 = arith.constant -1.000000e+30 : f32
    %26 = vector.broadcast %cst_7 : f32 to vector<8x8x128xf32>
    %27 = arith.select %25, %22, %26 : vector<8x8x128xi1>, vector<8x8x128xf32>
    %cst_8 = arith.constant dense<0xFF800000> : vector<8x128xf32>
    %28 = vector.multi_reduction <maximumf>, %27, %cst_8 [1] : vector<8x8x128xf32> to vector<8x128xf32>
    %29 = vector.extract_strided_slice %3 {offsets = [0, 640], sizes = [64, 128], strides = [1, 1]} : vector<64x1152xf32> to vector<64x128xf32>
    %30 = vector.extract_strided_slice %3 {offsets = [0, 768], sizes = [64, 128], strides = [1, 1]} : vector<64x1152xf32> to vector<64x128xf32>
    %c63_i32_9 = arith.constant 63 : i32
    %31 = tpu.dynamic_rotate %30 by %c63_i32_9 dim 0 : vector<64x128xf32>, i32 -> vector<64x128xf32>
    %32 = arith.addf %29, %31 : vector<64x128xf32>
    %33 = vector.extract_strided_slice %3 {offsets = [0, 896], sizes = [64, 128], strides = [1, 1]} : vector<64x1152xf32> to vector<64x128xf32>
    %c62_i32_10 = arith.constant 62 : i32
    %34 = tpu.dynamic_rotate %33 by %c62_i32_10 dim 0 : vector<64x128xf32>, i32 -> vector<64x128xf32>
    %35 = arith.addf %32, %34 : vector<64x128xf32>
    %36 = vector.extract_strided_slice %3 {offsets = [0, 1024], sizes = [64, 128], strides = [1, 1]} : vector<64x1152xf32> to vector<64x128xf32>
    %c61_i32 = arith.constant 61 : i32
    %37 = tpu.dynamic_rotate %36 by %c61_i32 dim 0 : vector<64x128xf32>, i32 -> vector<64x128xf32>
    %38 = arith.addf %35, %37 : vector<64x128xf32>
    %39 = vector.shape_cast %38 : vector<64x128xf32> to vector<8x8x128xf32>
    %40 = tpu.iota {dimensions = array<i32: 1>} : vector<8x8x128xi32>
    %c4_i32 = arith.constant 4 : i32
    %41 = vector.broadcast %c4_i32 : i32 to vector<8x8x128xi32>
    %42 = arith.cmpi sle, %40, %41 : vector<8x8x128xi32>
    %cst_11 = arith.constant -1.000000e+30 : f32
    %43 = vector.broadcast %cst_11 : f32 to vector<8x8x128xf32>
    %44 = arith.select %42, %39, %43 : vector<8x8x128xi1>, vector<8x8x128xf32>
    %cst_12 = arith.constant dense<0xFF800000> : vector<8x128xf32>
    %45 = vector.multi_reduction <maximumf>, %44, %cst_12 [1] : vector<8x8x128xf32> to vector<8x128xf32>
    %46 = tpu.concatenate %14, %28, %45 in 1 : vector<8x128xf32>, vector<8x128xf32>, vector<8x128xf32> -> vector<8x384xf32>
    %c0_13 = arith.constant 0 : index
    %c0_14 = arith.constant 0 : index
    %47 = vector.load %arg3[%c0_13, %c0_14] : memref<1x384xf32, #tpu.memory_space<vmem>>, vector<1x384xf32>
    %48 = vector.broadcast %47 : vector<1x384xf32> to vector<8x384xf32>
    %49 = arith.addf %46, %48 : vector<8x384xf32>
    %cst_15 = arith.constant 0.000000e+00 : f32
    %50 = vector.broadcast %cst_15 : f32 to vector<8x384xf32>
    %51 = arith.maximumf %49, %50 : vector<8x384xf32>
    %c0_16 = arith.constant 0 : index
    %c0_17 = arith.constant 0 : index
    %52 = vector.load %arg4[%c0_16, %c0_17] : memref<384x512xf32, #tpu.memory_space<vmem>>, vector<384x512xf32>
    %cst_18 = arith.constant dense<0.000000e+00> : vector<8x512xf32>
    %53 = tpu.matmul %51, %52, %cst_18 {dimension_numbers = #tpu.dot_dimension_numbers<[1], [0], [0], [1], [0, 0, 1, 1], [], []>} : vector<8x384xf32>, vector<384x512xf32>, vector<8x512xf32> -> vector<8x512xf32>
    %c0_19 = arith.constant 0 : index
    %c0_20 = arith.constant 0 : index
    %54 = vector.load %arg5[%c0_19, %c0_20] : memref<1x512xf32, #tpu.memory_space<vmem>>, vector<1x512xf32>
    %55 = vector.broadcast %54 : vector<1x512xf32> to vector<8x512xf32>
    %56 = arith.addf %53, %55 : vector<8x512xf32>
    %cst_21 = arith.constant 0.000000e+00 : f32
    %57 = vector.broadcast %cst_21 : f32 to vector<8x512xf32>
    %58 = arith.maximumf %56, %57 : vector<8x512xf32>
    %c0_22 = arith.constant 0 : index
    %c0_23 = arith.constant 0 : index
    %59 = vector.load %arg6[%c0_22, %c0_23] : memref<512x128xf32, #tpu.memory_space<vmem>>, vector<512x128xf32>
    %cst_24 = arith.constant dense<0.000000e+00> : vector<8x128xf32>
    %60 = tpu.matmul %58, %59, %cst_24 {dimension_numbers = #tpu.dot_dimension_numbers<[1], [0], [0], [1], [0, 0, 1, 1], [], []>} : vector<8x512xf32>, vector<512x128xf32>, vector<8x128xf32> -> vector<8x128xf32>
    %c0_25 = arith.constant 0 : index
    %c0_26 = arith.constant 0 : index
    %61 = vector.load %arg7[%c0_25, %c0_26] : memref<1x128xf32, #tpu.memory_space<vmem>>, vector<1x128xf32>
    %62 = vector.broadcast %61 : vector<1x128xf32> to vector<8x128xf32>
    %63 = arith.addf %60, %62 : vector<8x128xf32>
    %c0_27 = arith.constant 0 : index
    %c0_28 = arith.constant 0 : index
    %64 = vector.load %arg8[%c0_27, %c0_28] : memref<8x128xf32, #tpu.memory_space<vmem>>, vector<8x128xf32>
    tpu.vector_store %arg8[%c0_27, %c0_28], %63 {strides = array<i32>} : memref<8x128xf32, #tpu.memory_space<vmem>>, vector<8x128xf32>,
    return
  }
  func.func @transform_0(%arg0: i32) -> (i32, i32, i32) {
    %c0_i32 = arith.constant 0 : i32
    %c0_i32_0 = arith.constant 0 : i32
    %c0_i32_1 = arith.constant 0 : i32
    return %arg0, %c0_i32, %c0_i32_0 : i32, i32, i32
  }
  func.func @transform_1(%arg0: i32) -> (i32, i32) {
    %c0_i32 = arith.constant 0 : i32
    %c0_i32_0 = arith.constant 0 : i32
    %c0_i32_1 = arith.constant 0 : i32
    return %c0_i32, %c0_i32_0 : i32, i32
  }
  func.func @transform_2(%arg0: i32) -> (i32, i32) {
    %c0_i32 = arith.constant 0 : i32
    %c0_i32_0 = arith.constant 0 : i32
    %c0_i32_1 = arith.constant 0 : i32
    return %c0_i32, %c0_i32_0 : i32, i32
  }
  func.func @transform_3(%arg0: i32) -> (i32, i32) {
    %c0_i32 = arith.constant 0 : i32
    %c0_i32_0 = arith.constant 0 : i32
    %c0_i32_1 = arith.constant 0 : i32
    return %c0_i32, %c0_i32_0 : i32, i32
  }
  func.func @transform_4(%arg0: i32) -> (i32, i32) {
    %c0_i32 = arith.constant 0 : i32
    %c0_i32_0 = arith.constant 0 : i32
    %c0_i32_1 = arith.constant 0 : i32
    return %c0_i32, %c0_i32_0 : i32, i32
  }
  func.func @transform_5(%arg0: i32) -> (i32, i32) {
    %c0_i32 = arith.constant 0 : i32
    %c0_i32_0 = arith.constant 0 : i32
    %c0_i32_1 = arith.constant 0 : i32
    return %c0_i32, %c0_i32_0 : i32, i32
  }
  func.func @transform_6(%arg0: i32) -> (i32, i32) {
    %c0_i32 = arith.constant 0 : i32
    %c0_i32_0 = arith.constant 0 : i32
    %c0_i32_1 = arith.constant 0 : i32
    return %c0_i32, %c0_i32_0 : i32, i32
  }
  func.func @transform_7(%arg0: i32) -> (i32, i32) {
    %c0_i32 = arith.constant 0 : i32
    %c0_i32_0 = arith.constant 0 : i32
    return %arg0, %c0_i32 : i32, i32
  }
}

</mosaic_0001>

<bundles_post_ra>
// kernel: tpu_custom_call.1
= control target key start
LH: loop header
LB: loop body
LE: loop exit
PB: predicated region body
PF: predicated region fallthrough
CT: control target
= control target key end

     0   :  { %s3790_s0 = inlined_call_operand.hbm [shape: f32[16,8,32], index: 0, kind: input, shape index: {}]   ;;  %s3791_s1 = inlined_call_operand.hbm [shape: f32[32,1152], index: 1, kind: input, shape index: {}]   ;;  %s3792_s2 = inlined_call_operand.vmem [shape: f32[1,384], index: 2, kind: input, shape index: {}]   ;;  %s3793_s3 = inlined_call_operand.hbm [shape: f32[384,512], index: 3, kind: input, shape index: {}]   ;;  %s3794_s4 = inlined_call_operand.vmem [shape: f32[1,512], index: 4, kind: input, shape index: {}]   ;;  %s3795_s5 = inlined_call_operand.hbm [shape: f32[512,128], index: 5, kind: input, shape index: {}]   ;;  %s3796_s6 = inlined_call_operand.vmem [shape: f32[1,128], index: 6, kind: input, shape index: {}]   ;;  %s3797_s7 = inlined_call_operand.hbm [shape: f32[16,128], index: 7, kind: output, shape index: {}]  }
   0x1   :  { %3807 = sst [smem:[#allocation15_spill]] %s3791_s1 }
   0x2   :  { %12 = vsyncpa [#allocation3], 0 }
   0x3   :  { %14 = vsyncpa [#allocation3 + $0x1], 0 }
   0x4   :  { %15 = vsyncpa [#allocation6], 0 }
   0x5   :  { %16 = vsyncpa [#allocation9], 0 }
   0x6   :  { %17 = vsyncpa [#allocation4], 0 }
   0x7   :  { %19 = vsyncpa [#allocation4 + $0x1], 0  ;;  %s2991_s24 = smov 0   ;;  %s2993_s25 = smov 0  }
   0x8   :  { %s2995_s26 = smov 0   ;;  %s2997_s27 = smov 0  }
   0x9 LB: > { %s3012_s28 = sadd.s32 4294967295, %s2937_s27   ;;  %s2193_s29 = sadd.s32 4294967294, %s2937_s27   ;;  %s2937_s27 = sphi %s2997_s27, %s3839_s27   ;;  %s2933_s26 = sphi %s2995_s26, %s3838_s26   ;;  %s2929_s25 = sphi %s2993_s25, %s3837_s25   ;;  %s2925_s24 = sphi %s2991_s24, %s3836_s24  }
   0xa   : > { %p45_p0 = scmp.ne.s32.totalorder %s2929_s25, %s2925_s24  ;;  %p3798_p1 = scmp.eq.s32.totalorder %s3012_s28, 0 }
   0xb   : > { %p201_p3 = scmp.eq.s32.totalorder %s2193_s29, 1  ;;  %p2194_p5 = scmp.ge.s32.totalorder %s2937_s27, 1 }
   0xc   : > { %p3021_p4 = por %p3798_p1, %p45_p0  ;;  %p208_p7 = scmp.lt.s32.totalorder %s2937_s27, 3 }
   0xd   : > { %p3026_p6 = por %p201_p3, %p45_p0  ;;  %s2939_s10 = smov [#allocation5]  }
   0xe   : > { %s3808_s30 = scalar_select %p3021_p4, 1, 0 }
   0xf   : > { %s3809_s8 = scalar_select %p3026_p6, 1, 0 }
  0x10   : > { %p3031_p8 = pnand %p2194_p5, %p208_p7  ;;  %s220_s11 = sshll.u32 %s2939_s10, 4  ;;  %s3035_s11 = int_to_ptr.vmem [resolvable:$true] %s220_s11 }
  0x11   : > { %s2940_s13 = smov [#allocation7]   ;;  %s3812_s1 = sld [smem:[#allocation15_spill]] }
  0x12   : > { %s3810_s9 = scalar_select %p3031_p8, 1, 0 }
  0x13   : > { %p2680_p9 = pneg %p3031_p8  ;;  %s236_s14 = sshll.u32 %s2940_s13, 4  ;;  %s3046_s14 = int_to_ptr.vmem [resolvable:$true] %s236_s14 }
  0x15   : > { %p3042_p11 = pnand %p2680_p9, %p3798_p1 }
  0x17   : > { %s2749_s17 = scalar_lea.hbm %s3812_s1, 4608  ;;  %p3056_p13 = pneg %p3042_p11 }
  0x18   : > { %p2750_p12 = scmp.ne.s32.totalorder %s3812_s1, %s2749_s17  ;;  %p2756_p5 = scmp.lt.u32.totalorder %s2749_s17, %s3812_s1 }
  0x1a   : > { %p2752_p0 = pnand %p3056_p13, %p2750_p12 }
  0x1c   : > { %p2753_p3 = pneg %p2752_p0 }
  0x1e   : > { %p2758_p7 = pnand %p2756_p5, %p2753_p3 }
  0x20   : > { %2761 = shalt.err (!%p2758_p7)
}
  0x21   : > { %s2762_s23 = scalar_lea.vmem %s3035_s11, 4608  ;;  %p2770_p2 = scmp.lt.s32.totalorder %s3035_s11, %s3035_s11 }
  0x22   : > { %p2763_p9 = scmp.ne.s32.totalorder %s3035_s11, %s2762_s23  ;;  %p2771_p6 = scmp.lt.s32.totalorder %s2762_s23, %s2762_s23 }
  0x24   : > { %p2765_p10 = pnand %p2763_p9, %p3056_p13  ;;  %p2772_p12 = por %p2771_p6, %p2770_p2 }
  0x26   : > { %p2766_p1 = pneg %p2765_p10 }
  0x28   : > { %p2773_p0 = pnand %p2772_p12, %p2766_p1 }
  0x2a   : > { %2776 = shalt.err (!%p2773_p0)
}
  0x2b   : > { %s2941_s29 = smov 1152   ;;  %s2942_s10 = smov 72  }
  0x2c   : > { %2683 = dma.hbm_to_vmem [thread:$0]  (!%p3042_p11), %s3812_s1, 4608, %s3035_s11, [#allocation6], %s2941_s29, %s2941_s29, %s2942_s10  }
  0x2d   : > { %s2777_s18 = scalar_lea.hbm %s3793_s3, 24576 }
  0x2e   : > { %p2778_p2 = scmp.ne.s32.totalorder %s3793_s3, %s2777_s18  ;;  %p2784_p10 = scmp.lt.u32.totalorder %s2777_s18, %s3793_s3 }
  0x30   : > { %p2780_p1 = pnand %p2778_p2, %p3056_p13 }
  0x32   : > { %p2781_p6 = pneg %p2780_p1 }
  0x34   : > { %p2786_p3 = pnand %p2784_p10, %p2781_p6 }
  0x36   : > { %2789 = shalt.err (!%p2786_p3)
}
  0x37   : > { %s2790_s11 = scalar_lea.vmem %s3046_s14, 24576  ;;  %p2798_p12 = scmp.lt.s32.totalorder %s3046_s14, %s3046_s14 }
  0x38   : > { %p2791_p5 = scmp.ne.s32.totalorder %s3046_s14, %s2790_s11  ;;  %p2799_p0 = scmp.lt.s32.totalorder %s2790_s11, %s2790_s11 }
  0x3a   : > { %p2793_p7 = pnand %p2791_p5, %p3056_p13  ;;  %p2800_p2 = por %p2799_p0, %p2798_p12 }
  0x3c   : > { %p2794_p9 = pneg %p2793_p7 }
  0x3e   : > { %p2801_p1 = pnand %p2800_p2, %p2794_p9 }
  0x40   : > { %2804 = shalt.err (!%p2801_p1)
}
  0x41   : > { %s2943_s29 = smov 512   ;;  %s2944_s10 = smov 32  }
  0x42   : > { %2686 = dma.hbm_to_vmem [thread:$0]  (!%p3042_p11), %s3793_s3, 24576, %s3046_s14, [#allocation6], %s2943_s29, %s2943_s29, %s2944_s10  }
  0x43   : > { %s2945_s16 = smov [#allocation8]   ;;  %s2805_s21 = scalar_lea.hbm %s3795_s5, 8192 }
  0x44   : > { %s252_s17 = sshll.u32 %s2945_s16, 4  ;;  %p2806_p6 = scmp.ne.s32.totalorder %s3795_s5, %s2805_s21  ;;  %s253_s17 = int_to_ptr.vmem [resolvable:$true] %s252_s17 }
  0x45   : > { %p2812_p5 = scmp.lt.u32.totalorder %s2805_s21, %s3795_s5 }
  0x46   : > { %p2808_p10 = pnand %p2806_p6, %p3056_p13 }
  0x48   : > { %p2809_p3 = pneg %p2808_p10 }
  0x4a   : > { %p2814_p7 = pnand %p2812_p5, %p2809_p3 }
  0x4c   : > { %2817 = shalt.err (!%p2814_p7)
}
  0x4d   : > { %s2818_s14 = scalar_lea.vmem %s253_s17, 8192  ;;  %p2826_p2 = scmp.lt.s32.totalorder %s253_s17, %s253_s17 }
  0x4e   : > { %p2819_p9 = scmp.ne.s32.totalorder %s253_s17, %s2818_s14  ;;  %p2827_p1 = scmp.lt.s32.totalorder %s2818_s14, %s2818_s14 }
  0x50   : > { %p2821_p12 = pnand %p2819_p9, %p3056_p13  ;;  %p2828_p4 = por %p2827_p1, %p2826_p2 }
  0x52   : > { %p2822_p0 = pneg %p2821_p12 }
  0x54   : > { %p2829_p8 = pnand %p2828_p4, %p2822_p0 }
  0x56   : > { %2832 = shalt.err (!%p2829_p8)
}
  0x57   : > { %s2946_s29 = smov 128   ;;  %s2947_s1 = smov 8  }
  0x58   : > { %2689 = dma.hbm_to_vmem [thread:$0]  (!%p3042_p11), %s3795_s5, 8192, %s253_s17, [#allocation9], %s2946_s29, %s2946_s29, %s2947_s1  }
  0x59   : > { %s3122_s13 = sadd.s32 1, %s2937_s27   ;;  %s32_s16 = sadd.s32 1, %s2933_s26 }
  0x5a   : > { %s29_s15 = ssub.s32 %s2937_s27, %s3122_s13  ;;  %p39_p8 = scmp.ne.s32.totalorder %s2933_s26, %s2929_s25 }
  0x5b   : > { %p30_p4 = scmp.eq.s32.totalorder %s29_s15, 0  ;;  %p40_p13 = scmp.eq.s32.totalorder %s2937_s27, 0 }
  0x5c   : > { %p2701_p6 = scmp.lt.s32.totalorder %s2937_s27, 2  ;;  %p3814_p3 = scmp.eq.s32.totalorder %s3012_s28, 1 }
  0x5d   : > { %s3132_s18 = scalar_select %p30_p4, %s2933_s26, %s32_s16  }
  0x5e   : > { %p41_p10 = por %p40_p13, %p39_p8  ;;  %p3136_p5 = por %p3814_p3, %p39_p8 }
  0x5f   : > { %s269_s19 = sand.u32 1, %s2933_s26   ;;  %s2253_s21 = sshll.u32 %s2937_s27, 10 }
  0x60   : > { %s2199_s17 = sshll.u32 %s269_s19, 6  ;;  %s3145_s11 = scalar_lea.hbm %s3790_s0, %s2253_s21 }
  0x61   : > { %s273_s14 = scalar_lea.vmem [#allocation2], %s2199_s17  ;;  %p3147_p11 = pnand %p2701_p6, %p41_p10 }
  0x62   : > { %s280_s20 = sshll.u32 %s273_s14, 4  ;;  %s3153_s15 = scalar_lea.sflag [#allocation3], %s269_s19  ;;  %s3151_s20 = int_to_ptr.vmem [resolvable:$true] %s280_s20 }
  0x63   : > { %s2833_s16 = scalar_lea.hbm %s3145_s11, 1024  ;;  %p2835_p9 = pneg %p3147_p11 }
  0x64   : > { %p2834_p7 = scmp.ne.s32.totalorder %s3145_s11, %s2833_s16  ;;  %s2838_s22 = scalar_lea.hbm %s3790_s0, 2048 }
  0x65   : > { %p2839_p2 = scmp.lt.u32.totalorder %s3145_s11, %s3790_s0  ;;  %p2840_p1 = scmp.lt.u32.totalorder %s2838_s22, %s2833_s16 }
  0x66   : > { %p2836_p12 = pnand %p2835_p9, %p2834_p7  ;;  %p2842_p8 = scmp.lt.u32.totalorder %s2833_s16, %s3145_s11 }
  0x67   : > { %p2841_p4 = por %p2840_p1, %p2839_p2 }
  0x68   : > { %p2837_p0 = pneg %p2836_p12 }
  0x69   : > { %p2843_p13 = por %p2842_p8, %p2841_p4 }
  0x6b   : > { %p2844_p6 = pnand %p2843_p13, %p2837_p0 }
  0x6d   : > { %2847 = shalt.err (!%p2844_p6)
}
  0x6e   : > { %s2848_s19 = scalar_lea.vmem %s3151_s20, 1024  ;;  %s2948_s21 = smov [#allocation2]  }
  0x6f   : > { %p2849_p10 = scmp.ne.s32.totalorder %s3151_s20, %s2848_s19  ;;  %s2853_s17 = sshll.u32 %s2948_s21, 4  ;;  %s2854_s17 = int_to_ptr.vmem [resolvable:$false] %s2853_s17 }
  0x70   : > { %s2855_s23 = scalar_lea.vmem %s2854_s17, 2048  ;;  %p2856_p12 = scmp.lt.s32.totalorder %s3151_s20, %s2854_s17 }
  0x71   : > { %p2851_p3 = pnand %p2849_p10, %p2835_p9  ;;  %p2857_p2 = scmp.lt.s32.totalorder %s2855_s23, %s2848_s19 }
  0x73   : > { %p2852_p7 = pneg %p2851_p3  ;;  %p2858_p1 = por %p2857_p2, %p2856_p12 }
  0x75   : > { %p2859_p4 = pnand %p2858_p1, %p2852_p7 }
  0x77   : > { %2862 = shalt.err (!%p2859_p4)
}
  0x78   : > { %2693 = dma.hbm_to_vmem [thread:$0]  (!%p3147_p11), %s3145_s11, 1024, %s3151_s20, %s3153_s15, %s2946_s29, %s2946_s29, %s2947_s1  }
  0x79   : > { %p3817_p9 = scmp.ne.s32.totalorder %s3810_s9, 0 }
  0x7a   : > { %s3187_s16 = sand.u32 (!%p3817_p9), 1, %s2929_s25   ;;  %p3818_p0 = scmp.ne.s32.totalorder (!%p3817_p9), %s3808_s30, 0 }
  0x7b   : > { %292 = sbr.rel (%p3817_p9) target bundleno = 932 (0x3a4), region = 48  ;;  %s2203_s22 = sshll.u32 (!%p3817_p9), %s3187_s16, 6 }
  0x7c   : > { %s295_s14 = scalar_lea.sflag (!%p3817_p9), [#allocation3], %s3187_s16  ;;  %s3191_s19 = scalar_lea.vmem (!%p3817_p9), [#allocation2], %s2203_s22 }
  0x82   : > { %2908 = dma.done.wait (%p3818_p0), %s295_s14, 1024  }
  0x83   : > { %2910 = vsyncadd (%p3818_p0), %s295_s14, 4294966272  ;;  %p3819_p11 = scmp.eq.s32.totalorder %s3012_s28, 0 }
  0x85   : > { %2912 = dma.done.wait (%p3819_p11), [#allocation6], 29184   ;;  %p3820_p8 = pmov %p3819_p11 }
  0x87   : > { %2914 = vsyncadd (%p3820_p8), [#allocation6], 4294938112  ;;  %p3821_p13 = pmov %p3820_p8 }
  0x88   : > { %p3822_p6 = pmov %p3820_p8 }
  0x89   : > { %2916 = dma.done.wait (%p3821_p13), [#allocation9], 8192  }
  0x8a   : > { %2918 = vsyncadd (%p3822_p6), [#allocation9], 4294959104  ;;  %v3803_v0 = vmov 0.0   ;;  %v351_v1 = vld [vmem:[#allocation5 + $0x8] sm:$0xff]  ;;  %v360_v2 = vld [vmem:[#allocation5 + $0x50] sm:$0xff]  ;;  %vm386_vm0 = vcmask 261120  }
  0x8b   : > { %475 = vmatprep.mubr.f32.mxu0 %v3803_v0  ;;  %499 = vmatprep.mubr.f32.mxu1 %v3803_v0  ;;  %v350_v3 = vld [vmem:[#allocation5] sm:$0xff]  ;;  %v2356_v4 = vpack.c.bf16 %v360_v2, %v351_v1  ;;  %v359_v5 = vld [vmem:[#allocation5 + $0x48] sm:$0xff]  ;;  %v369_v6 = vld [vmem:[#allocation5 + $0x98] sm:$0xff]  ;;  %vm1296_vm3 = vcmask 1041409   ;;  %vm1298_vm6 = vcmask 1042434   ;;  %vm1300_vm7 = vcmask 1043459  }
  0x8c   : > { %v378_v7 = vld [vmem:[#allocation5 + $0xe0] sm:$0xff]  ;;  %v2358_v8 = vpack.c.bf16 %v359_v5, %v350_v3  ;;  %v368_v10 = vld [vmem:[#allocation5 + $0x90] sm:$0xff]  ;;  %v377_v11 = vld [vmem:[#allocation5 + $0xd8] sm:$0xff]  ;;  %vm1302_vm8 = vcmask 1044484   ;;  %vm1304_vm9 = vcmask 1045509   ;;  %vm1306_vm10 = vcmask 1046534  }
  0x8d   : > { %v2360_v9 = vpack.c.bf16 %v378_v7, %v369_v6  ;;  %2357 = vmatprep.subr.bf16.mxu0 %v2356_v4  ;;  %2652 = vmatprep.subr.bf16.mxu1 %v2356_v4  ;;  %v353_v12 = vld [vmem:[#allocation5 + $0x18] sm:$0xff]  ;;  %v362_v13 = vld [vmem:[#allocation5 + $0x60] sm:$0xff]  ;;  %v2362_v14 = vpack.c.bf16 %v377_v11, %v368_v10  ;;  %v352_v15 = vld [vmem:[#allocation5 + $0x10] sm:$0xff]  ;;  %vm1308_vm11 = vcmask 1047559   ;;  %s2207_s10 = sshll.u32 %s3187_s16, 3  ;;  %s2250_s17 = sshll.u32 %s3012_s28, 7 }
  0x8e   : > { %2359 = vmatpush1.bf16.msra.mxu0 %v2358_v8  ;;  %2654 = vmatpush1.bf16.msra.mxu1 %v2358_v8  ;;  %v2364_v16 = vpack.c.bf16 %v362_v13, %v353_v12  ;;  %v361_v17 = vld [vmem:[#allocation5 + $0x58] sm:$0xff]  ;;  %v355_v18 = vld [vmem:[#allocation5 + $0x28] sm:$0xff]  ;;  %v364_v19 = vld [vmem:[#allocation5 + $0x70] sm:$0xff]  ;;  %s340_s23 = scalar_lea.vmem [#allocation10], %s2207_s10  ;;  %s3746_s30 = scalar_lea.hbm %s3797_s7, %s2250_s17 }
  0x8f   : > { %2361 = vmatprep.subr.bf16.mxu0 %v2360_v9  ;;  %2653 = vmatprep.subr.bf16.mxu1 %v2360_v9  ;;  %v2372_v20 = vpack.c.bf16 %v364_v19, %v355_v18  ;;  %v354_v21 = vld [vmem:[#allocation5 + $0x20] sm:$0xff]  ;;  %v363_v22 = vld [vmem:[#allocation5 + $0x68] sm:$0xff]  ;;  %v380_v24 = vld [vmem:[#allocation5 + $0xf0] sm:$0xff]  ;;  %v2366_v27 = vpack.c.bf16 %v361_v17, %v352_v15  ;;  %s2094_s22 = sshll.u32 %s340_s23, 4  ;;  %s2081_s9 = scalar_lea.sflag [#allocation4], %s3187_s16  ;;  %s3748_s22 = int_to_ptr.vmem [resolvable:$true] %s2094_s22 }
  0x90   : > { %v371_v23 = vld [vmem:[#allocation5 + $0xa8] sm:$0xff]  ;;  %v3208_v25 = vld [vmem:[%s3191_s19] sm:$0xff]  ;;  %v2374_v28 = vpack.c.bf16 %v363_v22, %v354_v21  ;;  %v373_v30 = vld [vmem:[#allocation5 + $0xb8] sm:$0xff]  ;;  %s2863_s29 = scalar_lea.vmem %s3748_s22, 128  ;;  %s2950_s28 = smov [#allocation10]  }
  0x91   : > { %v3211_v26 = vld [vmem:[%s3191_s19 + $0x20] sm:$0xff]  ;;  %v2368_v32 = vpack.c.bf16 %v380_v24, %v371_v23  ;;  %v379_v33 = vld [vmem:[#allocation5 + $0xe8] sm:$0xff]  ;;  %v372_v35 = vld [vmem:[#allocation5 + $0xb0] sm:$0xff]  ;;  %p2864_p10 = scmp.ne.s32.totalorder %s3748_s22, %s2863_s29  ;;  %s2867_s1 = sshll.u32 %s2950_s28, 4  ;;  %s2868_s1 = int_to_ptr.vmem [resolvable:$false] %s2867_s1 }
  0x92   : > { %2363 = vmatpush1.bf16.msra.mxu0 %v2362_v14  ;;  %2655 = vmatpush1.bf16.msra.mxu1 %v2362_v14  ;;  %v370_v29 = vld [vmem:[#allocation5 + $0xa0] sm:$0xff]  ;;  %v381_v36 = vld [vmem:[#allocation5 + $0xf8] sm:$0xff]  ;;  %v3219_v39 = vld [vmem:[%s3191_s19 + $0x8] sm:$0xff]  ;;  %s2869_s11 = scalar_lea.vmem %s2868_s1, 256  ;;  %p2870_p12 = scmp.lt.s32.totalorder %s3748_s22, %s2868_s1 }
  0x93   : > { %2365 = vmatprep.subr.bf16.mxu1 %v2364_v16  ;;  %2373 = vmatprep.subr.bf16.mxu0 %v2372_v20  ;;  %v382_v31 = vld [vmem:[#allocation5 + $0x100] sm:$0xff]  ;;  %v357_v37 = vld [vmem:[#allocation5 + $0x38] sm:$0xff]  ;;  %v3222_v40 = vld [vmem:[%s3191_s19 + $0x28] sm:$0xff]  ;;  %v2370_v41 = vpack.c.bf16 %v379_v33, %v370_v29  ;;  %v2378_v42 = vpack.c.bf16 %v381_v36, %v372_v35  ;;  %p2865_p3 = pnand %p2864_p10, %p3136_p5  ;;  %p2871_p2 = scmp.lt.s32.totalorder %s2869_s11, %s2863_s29 }
  0x94   : > { %v2376_v34 = vpack.c.bf16 %v382_v31, %v373_v30  ;;  %v366_v38 = vld [vmem:[#allocation5 + $0x80] sm:$0xff]  ;;  %v367_v44 = vld [vmem:[#allocation5 + $0x88] sm:$0xff]  ;;  %v3232_v47 = vld [vmem:[%s3191_s19 + $0x10] sm:$0xff] }
  0x95   : > { %2208 = vmatmul.mubr.msk.f32.vlgmr.msra.gmra.mrb[0].mxu0 %vm386_vm0, %v3208_v25  ;;  %2212 = vmatmul.mubr.msk.f32.vlgmr.msra.gmra.mrb[0].mxu1 %vm386_vm0, %v3211_v26  ;;  %v358_v43 = vld [vmem:[#allocation5 + $0x40] sm:$0xff]  ;;  %v2380_v45 = vpack.c.bf16 %v366_v38, %v357_v37  ;;  %v3235_v48 = vld [vmem:[%s3191_s19 + $0x30] sm:$0xff]  ;;  %v3244_v49 = vld [vmem:[%s3191_s19 + $0x18] sm:$0xff]  ;;  %p2866_p7 = pneg %p2865_p3  ;;  %p2872_p1 = por %p2871_p2, %p2870_p12 }
  0x96   : > { %2367 = vmatpush1.bf16.msra.mxu1 %v2366_v27  ;;  %481 = vmatprep.mubr.f32.mxu0 %v3803_v0  ;;  %v2388_v46 = vpack.c.bf16 %v367_v44, %v358_v43  ;;  %v3247_v50 = vld [vmem:[%s3191_s19 + $0x38] sm:$0xff]  ;;  %v356_v51 = vld [vmem:[#allocation5 + $0x30] sm:$0xff]  ;;  %v375_v53 = vld [vmem:[#allocation5 + $0xc8] sm:$0xff] }
  0x97   : > { %505 = vmatprep.mubr.f32.mxu1 %v3803_v0  ;;  %2375 = vmatpush1.bf16.msra.mxu0 %v2374_v28  ;;  %v365_v52 = vld [vmem:[#allocation5 + $0x78] sm:$0xff]  ;;  %v384_v54 = vld [vmem:[#allocation5 + $0x110] sm:$0xff]  ;;  %v374_v57 = vld [vmem:[#allocation5 + $0xc0] sm:$0xff]  ;;  %p2873_p4 = pnand %p2872_p1, %p2866_p7 }
  0x98   : > { %2369 = vmatprep.subr.bf16.mxu1 %v2368_v32  ;;  %2377 = vmatprep.subr.bf16.mxu0 %v2376_v34  ;;  %v2382_v55 = vpack.c.bf16 %v365_v52, %v356_v51  ;;  %v2384_v56 = vpack.c.bf16 %v384_v54, %v375_v53  ;;  %v383_v58 = vld [vmem:[#allocation5 + $0x108] sm:$0xff]  ;;  %v376_v59 = vld [vmem:[#allocation5 + $0xd0] sm:$0xff]  ;;  %v385_v60 = vld [vmem:[#allocation5 + $0x118] sm:$0xff] }
  0x99   : > { %2209 = vmatmul.mubr.msk.f32.gmra.mrb[2].mxu0 %vm386_vm0, %v3219_v39  ;;  %2213 = vmatmul.mubr.msk.f32.gmra.mrb[2].mxu1 %vm386_vm0, %v3222_v40  ;;  %v2386_v61 = vpack.c.bf16 %v383_v58, %v374_v57  ;;  %v2392_v62 = vpack.c.bf16 %v385_v60, %v376_v59  ;;  %v1367_v63 = vld [vmem:[#allocation7 + $0x8] sm:$0xff]  ;;  %v1369_v2 = vld [vmem:[#allocation7 + $0x18] sm:$0xff]  ;;  %v1366_v5 = vld [vmem:[#allocation7] sm:$0xff] }
  0x9a   : > { %487 = vmatprep.mubr.f32.mxu0 %v3803_v0  ;;  %511 = vmatprep.mubr.f32.mxu1 %v3803_v0  ;;  %v1371_v1 = vld [vmem:[#allocation7 + $0x28] sm:$0xff]  ;;  %v1373_v4 = vld [vmem:[#allocation7 + $0x38] sm:$0xff]  ;;  %v1370_v6 = vld [vmem:[#allocation7 + $0x20] sm:$0xff] }
  0x9b   : > { %2371 = vmatpush1.bf16.msra.mxu1 %v2370_v41  ;;  %2379 = vmatpush1.bf16.msra.mxu0 %v2378_v42  ;;  %v2396_v3 = vpack.c.bf16 %v1371_v1, %v1367_v63  ;;  %v2492_v7 = vpack.c.bf16 %v1373_v4, %v1369_v2  ;;  %v2398_v8 = vpack.c.bf16 %v1370_v6, %v1366_v5  ;;  %v1368_v9 = vld [vmem:[#allocation7 + $0x10] sm:$0xff]  ;;  %v1375_v12 = vld [vmem:[#allocation7 + $0x48] sm:$0xff]  ;;  %v1377_v14 = vld [vmem:[#allocation7 + $0x58] sm:$0xff] }
  0x9c   : > { %2381 = vmatprep.subr.bf16.mxu1 %v2380_v45  ;;  %2389 = vmatprep.subr.bf16.mxu0 %v2388_v46  ;;  %v1372_v10 = vld [vmem:[#allocation7 + $0x30] sm:$0xff]  ;;  %v1379_v13 = vld [vmem:[#allocation7 + $0x68] sm:$0xff]  ;;  %v1381_v16 = vld [vmem:[#allocation7 + $0x78] sm:$0xff] }
  0x9d   : > { %2210 = vmatmul.mubr.msk.f32.gmra.mrb[4].mxu0 %vm386_vm0, %v3232_v47  ;;  %2214 = vmatmul.mubr.msk.f32.gmra.mrb[4].mxu1 %vm386_vm0, %v3235_v48  ;;  %v2494_v11 = vpack.c.bf16 %v1372_v10, %v1368_v9  ;;  %v2400_v15 = vpack.c.bf16 %v1379_v13, %v1375_v12  ;;  %v1374_v17 = vld [vmem:[#allocation7 + $0x40] sm:$0xff]  ;;  %v2496_v19 = vpack.c.bf16 %v1381_v16, %v1377_v14  ;;  %v1376_v21 = vld [vmem:[#allocation7 + $0x50] sm:$0xff]  ;;  %v1383_v24 = vld [vmem:[#allocation7 + $0x88] sm:$0xff] }
  0x9e   : > { %493 = vmatprep.mubr.f32.mxu0 %v3803_v0  ;;  %517 = vmatprep.mubr.f32.mxu1 %v3803_v0  ;;  %v1378_v18 = vld [vmem:[#allocation7 + $0x60] sm:$0xff]  ;;  %v1380_v22 = vld [vmem:[#allocation7 + $0x70] sm:$0xff]  ;;  %v1389_v28 = vld [vmem:[#allocation7 + $0xb8] sm:$0xff] }
  0x9f   : > { %v2402_v20 = vpack.c.bf16 %v1378_v18, %v1374_v17  ;;  %v2498_v23 = vpack.c.bf16 %v1380_v22, %v1376_v21  ;;  %v1382_v29 = vld [vmem:[#allocation7 + $0x80] sm:$0xff]  ;;  %v1384_v33 = vld [vmem:[#allocation7 + $0x90] sm:$0xff]  ;;  %v1391_v36 = vld [vmem:[#allocation7 + $0xc8] sm:$0xff] }
  0xa0   : > { %v1386_v30 = vld [vmem:[#allocation7 + $0xa0] sm:$0xff]  ;;  %v1388_v34 = vld [vmem:[#allocation7 + $0xb0] sm:$0xff]  ;;  %v1395_v37 = vld [vmem:[#allocation7 + $0xe8] sm:$0xff] }
  0xa1   : > { %2211 = vmatmul.mubr.msk.f32.gmra.mrb[6].mxu0 %vm386_vm0, %v3244_v49  ;;  %2215 = vmatmul.mubr.msk.f32.gmra.mrb[6].mxu1 %vm386_vm0, %v3247_v50  ;;  %v2406_v32 = vpack.c.bf16 %v1386_v30, %v1382_v29  ;;  %v2502_v35 = vpack.c.bf16 %v1388_v34, %v1384_v33  ;;  %v1393_v38 = vld [vmem:[#allocation7 + $0xd8] sm:$0xff]  ;;  %v1390_v41 = vld [vmem:[#allocation7 + $0xc0] sm:$0xff]  ;;  %v1392_v45 = vld [vmem:[#allocation7 + $0xd0] sm:$0xff] }
  0xa2   : > { %588 = vmatprep.mubr.f32.mxu1 %v3803_v0  ;;  %701 = vmatprep.mubr.f32.mxu0 %v3803_v0  ;;  %v1394_v42 = vld [vmem:[#allocation7 + $0xe0] sm:$0xff]  ;;  %v1405_v52 = vld [vmem:[#allocation7 + $0x138] sm:$0xff]  ;;  %v1400_v57 = vld [vmem:[#allocation7 + $0x110] sm:$0xff] }
  0xa3   : > { %v2410_v44 = vpack.c.bf16 %v1394_v42, %v1390_v41  ;;  %v1398_v53 = vld [vmem:[#allocation7 + $0x100] sm:$0xff]  ;;  %v1404_v58 = vld [vmem:[#allocation7 + $0x130] sm:$0xff]  ;;  %v1407_v60 = vld [vmem:[#allocation7 + $0x148] sm:$0xff] }
  0xa4   : > { %v1402_v54 = vld [vmem:[#allocation7 + $0x120] sm:$0xff]  ;;  %v2510_v59 = vpack.c.bf16 %v1404_v58, %v1400_v57  ;;  %v1413_v1 = vld [vmem:[#allocation7 + $0x178] sm:$0xff]  ;;  %v1408_v6 = vld [vmem:[#allocation7 + $0x150] sm:$0xff] }
  0xa5   : > { %2216 = vmatmul.mubr.msk.f32.vlgmr.msra.gmra.mrb[8].mxu1 %vm386_vm0, %v3208_v25  ;;  %2224 = vmatmul.mubr.msk.f32.vlgmr.msra.gmra.mrb[8].mxu0 %vm386_vm0, %v3208_v25  ;;  %v1406_v2 = vld [vmem:[#allocation7 + $0x140] sm:$0xff]  ;;  %v1415_v9 = vld [vmem:[#allocation7 + $0x188] sm:$0xff]  ;;  %v1421_v13 = vld [vmem:[#allocation7 + $0x1b8] sm:$0xff] }
  0xa6   : > { %2383 = vmatpush1.bf16.msra.mxu1 %v2382_v55  ;;  %594 = vmatprep.mubr.f32.mxu1 %v3803_v0  ;;  %v1419_v10 = vld [vmem:[#allocation7 + $0x1a8] sm:$0xff]  ;;  %v1414_v14 = vld [vmem:[#allocation7 + $0x180] sm:$0xff]  ;;  %v1416_v18 = vld [vmem:[#allocation7 + $0x190] sm:$0xff] }
  0xa7   : > { %707 = vmatprep.mubr.f32.mxu0 %v3803_v0  ;;  %2385 = vmatprep.subr.bf16.mxu1 %v2384_v56  ;;  %v2414_v56 = vpack.c.bf16 %v1402_v54, %v1398_v53  ;;  %v2420_v12 = vpack.c.bf16 %v1419_v10, %v1415_v9  ;;  %v1423_v21 = vld [vmem:[#allocation7 + $0x1c8] sm:$0xff]  ;;  %v1424_v30 = vld [vmem:[#allocation7 + $0x1d0] sm:$0xff]  ;;  %v1461_v10 = vld [vmem:[#allocation7 + $0x2f8] sm:$0xff] }
  0xa8   : > { %2391 = vmatpush3.bf16.msra.mxu0 %v2388_v46  ;;  %v1396_v46 = vld [vmem:[#allocation7 + $0xf0] sm:$0xff]  ;;  %v1427_v22 = vld [vmem:[#allocation7 + $0x1e8] sm:$0xff] }
  0xa9   : > { %2217 = vmatmul.mubr.msk.f32.gmra.mrb[10].mxu1 %vm386_vm0, %v3219_v39  ;;  %2225 = vmatmul.mubr.msk.f32.gmra.mrb[10].mxu0 %vm386_vm0, %v3219_v39  ;;  %v1431_v33 = vld [vmem:[#allocation7 + $0x208] sm:$0xff]  ;;  %v1432_v42 = vld [vmem:[#allocation7 + $0x210] sm:$0xff] }
  0xaa   : > { %600 = vmatprep.mubr.f32.mxu1 %v3803_v0  ;;  %713 = vmatprep.mubr.f32.mxu0 %v3803_v0  ;;  %v1435_v34 = vld [vmem:[#allocation7 + $0x228] sm:$0xff]  ;;  %v1440_v54 = vld [vmem:[#allocation7 + $0x250] sm:$0xff] }
  0xab   : > { %2387 = vmatpush1.bf16.msra.mxu1 %v2386_v61  ;;  %2393 = vmatprep.subr.bf16.mxu0 %v2392_v62  ;;  %v1411_v61 = vld [vmem:[#allocation7 + $0x168] sm:$0xff] }
  0xac   : > { %2395 = vmatpush3.bf16.msra.mxu0 %v2392_v62  ;;  %2397 = vmatprep.subr.bf16.mxu1 %v2396_v3  ;;  %v1409_v62 = vld [vmem:[#allocation7 + $0x158] sm:$0xff]  ;;  %v2416_v63 = vpack.c.bf16 %v1411_v61, %v1407_v60  ;;  %v1410_v3 = vld [vmem:[#allocation7 + $0x160] sm:$0xff]  ;;  %v1447_v57 = vld [vmem:[#allocation7 + $0x288] sm:$0xff] }
  0xad   : > { %2218 = vmatmul.mubr.msk.f32.gmra.mrb[12].mxu1 %vm386_vm0, %v3232_v47  ;;  %2226 = vmatmul.mubr.msk.f32.gmra.mrb[12].mxu0 %vm386_vm0, %v3232_v47  ;;  %v2512_v4 = vpack.c.bf16 %v1413_v1, %v1409_v62  ;;  %v2418_v5 = vpack.c.bf16 %v1410_v3, %v1406_v2  ;;  %v1451_v58 = vld [vmem:[#allocation7 + $0x2a8] sm:$0xff]  ;;  %v1453_v61 = vld [vmem:[#allocation7 + $0x2b8] sm:$0xff]  ;;  %v1446_v62 = vld [vmem:[#allocation7 + $0x280] sm:$0xff] }
  0xae   : > { %606 = vmatprep.mubr.f32.mxu1 %v3803_v0  ;;  %719 = vmatprep.mubr.f32.mxu0 %v3803_v0  ;;  %v2436_v60 = vpack.c.bf16 %v1451_v58, %v1447_v57  ;;  %v1448_v3 = vld [vmem:[#allocation7 + $0x290] sm:$0xff]  ;;  %v1493_v58 = vld [vmem:[#allocation7 + $0x3f8] sm:$0xff] }
  0xaf   : > { %2493 = vmatprep.subr.bf16.mxu0 %v2492_v7  ;;  %v1412_v7 = vld [vmem:[#allocation7 + $0x170] sm:$0xff] }
  0xb1   : > { %2219 = vmatmul.mubr.msk.f32.gmra.mrb[14].mxu1 %vm386_vm0, %v3244_v49  ;;  %2227 = vmatmul.mubr.msk.f32.gmra.mrb[14].mxu0 %vm386_vm0, %v3244_v49 }
  0xb2   : > { %612 = vmatprep.mubr.f32.mxu1 %v3803_v0  ;;  %725 = vmatprep.mubr.f32.mxu0 %v3803_v0 }
  0xb5   : > { %2220 = vmatmul.mubr.msk.f32.gmra.mrb[16].mxu1 %vm386_vm0, %v3211_v26  ;;  %2228 = vmatmul.mubr.msk.f32.gmra.mrb[16].mxu0 %vm386_vm0, %v3211_v26 }
  0xb6   : > { %618 = vmatprep.mubr.f32.mxu1 %v3803_v0  ;;  %731 = vmatprep.mubr.f32.mxu0 %v3803_v0 }
  0xb9   : > { %2221 = vmatmul.mubr.msk.f32.gmra.mrb[18].mxu1 %vm386_vm0, %v3222_v40  ;;  %2229 = vmatmul.mubr.msk.f32.gmra.mrb[18].mxu0 %vm386_vm0, %v3222_v40 }
  0xba   : > { %624 = vmatprep.mubr.f32.mxu1 %v3803_v0  ;;  %737 = vmatprep.mubr.f32.mxu0 %v3803_v0 }
  0xbd   : > { %2222 = vmatmul.mubr.msk.f32.gmra.mrb[20].mxu1 %vm386_vm0, %v3235_v48  ;;  %2230 = vmatmul.mubr.msk.f32.gmra.mrb[20].mxu0 %vm386_vm0, %v3235_v48 }
  0xbe   : > { %630 = vmatprep.mubr.f32.mxu1 %v3803_v0  ;;  %743 = vmatprep.mubr.f32.mxu0 %v3803_v0 }
  0xc1   : > { %2223 = vmatmul.mubr.msk.f32.gmra.mrb[22].mxu1 %vm386_vm0, %v3247_v50  ;;  %2231 = vmatmul.mubr.msk.f32.gmra.mrb[22].mxu0 %vm386_vm0, %v3247_v50 }
  0xc2   : > { %814 = vmatprep.mubr.f32.mxu1 %v3803_v0  ;;  %2344 = vmatprep.mubr.msk.f32.mxu0 %vm386_vm0, %v3208_v25 }
  0xc5   : > { %2232 = vmatmul.mubr.msk.f32.vlgmr.msra.gmra.mrb[24].mxu1 %vm386_vm0, %v3208_v25  ;;  %2345 = vmatmul.mubr.msk.f32.vlgmr.msra.gmra.mrb[24].mxu0 %vm386_vm0, %v3219_v39  ;;  %v1387_v25 = vld [vmem:[#allocation7 + $0xa8] sm:$0xff] }
  0xc6   : > { %820 = vmatprep.mubr.f32.mxu1 %v3803_v0  ;;  %2347 = vmatprep.mubr.msk.f32.mxu0 %vm386_vm0, %v3232_v47  ;;  %v2404_v27 = vpack.c.bf16 %v1387_v25, %v1383_v24  ;;  %v2424_v24 = vpack.c.bf16 %v1427_v22, %v1423_v21  ;;  %v1429_v25 = vld [vmem:[#allocation7 + $0x1f8] sm:$0xff] }
  0xc7   : > { %2399 = vmatpush1.bf16.msra.mxu1 %v2398_v8  ;;  %2495 = vmatpush1.bf16.msra.mxu0 %v2494_v11  ;;  %v2514_v8 = vpack.c.bf16 %v1412_v7, %v1408_v6  ;;  %v1417_v11 = vld [vmem:[#allocation7 + $0x198] sm:$0xff]  ;;  %v1455_v6 = vld [vmem:[#allocation7 + $0x2c8] sm:$0xff] }
  0xc8   : > { %2401 = vmatprep.subr.bf16.mxu1 %v2400_v15  ;;  %2497 = vmatprep.subr.bf16.mxu0 %v2496_v19  ;;  %v1418_v15 = vld [vmem:[#allocation7 + $0x1a0] sm:$0xff]  ;;  %v2516_v16 = vpack.c.bf16 %v1421_v13, %v1417_v11  ;;  %v1420_v19 = vld [vmem:[#allocation7 + $0x1b0] sm:$0xff]  ;;  %v1459_v7 = vld [vmem:[#allocation7 + $0x2e8] sm:$0xff] }
  0xc9   : > { %2233 = vmatmul.mubr.msk.f32.gmra.mrb[26].mxu1 %vm386_vm0, %v3219_v39  ;;  %2348 = vmatmul.mubr.msk.f32.gmra.mrb[26].mxu0 %vm386_vm0, %v3244_v49  ;;  %v2408_v39 = vpack.c.bf16 %v1395_v37, %v1391_v36  ;;  %v2422_v17 = vpack.c.bf16 %v1418_v15, %v1414_v14  ;;  %v2428_v36 = vpack.c.bf16 %v1435_v34, %v1431_v33  ;;  %v1437_v37 = vld [vmem:[#allocation7 + $0x238] sm:$0xff]  ;;  %v1454_v11 = vld [vmem:[#allocation7 + $0x2c0] sm:$0xff]  ;;  %v1456_v15 = vld [vmem:[#allocation7 + $0x2d0] sm:$0xff] }
  0xca   : > { %826 = vmatprep.mubr.f32.mxu1 %v3803_v0  ;;  %2350 = vmatprep.mubr.msk.f32.mxu0 %vm386_vm0, %v3211_v26  ;;  %v2440_v9 = vpack.c.bf16 %v1459_v7, %v1455_v6  ;;  %v1469_v22 = vld [vmem:[#allocation7 + $0x338] sm:$0xff] }
  0xcb   : > { %2403 = vmatpush1.bf16.msra.mxu1 %v2402_v20  ;;  %2499 = vmatpush1.bf16.msra.mxu0 %v2498_v23  ;;  %v2518_v20 = vpack.c.bf16 %v1420_v19, %v1416_v18  ;;  %v1425_v23 = vld [vmem:[#allocation7 + $0x1d8] sm:$0xff]  ;;  %v1463_v18 = vld [vmem:[#allocation7 + $0x308] sm:$0xff] }
  0xcc   : > { %2405 = vmatprep.subr.bf16.mxu1 %v2404_v27  ;;  %v1426_v27 = vld [vmem:[#allocation7 + $0x1e0] sm:$0xff]  ;;  %v1467_v19 = vld [vmem:[#allocation7 + $0x328] sm:$0xff]  ;;  %v1477_v34 = vld [vmem:[#allocation7 + $0x378] sm:$0xff] }
  0xcd   : > { %2234 = vmatmul.mubr.msk.f32.gmra.mrb[28].mxu1 %vm386_vm0, %v3232_v47  ;;  %2351 = vmatmul.mubr.msk.f32.gmra.mrb[28].mxu0 %vm386_vm0, %v3222_v40  ;;  %v2506_v47 = vpack.c.bf16 %v1396_v46, %v1392_v45  ;;  %v1439_v45 = vld [vmem:[#allocation7 + $0x248] sm:$0xff]  ;;  %v2444_v21 = vpack.c.bf16 %v1467_v19, %v1463_v18  ;;  %v1501_v7 = vld [vmem:[#allocation7 + $0x438] sm:$0xff] }
  0xce   : > { %832 = vmatprep.mubr.f32.mxu1 %v3803_v0  ;;  %2353 = vmatprep.mubr.msk.f32.mxu0 %vm386_vm0, %v3235_v48  ;;  %v1443_v46 = vld [vmem:[#allocation7 + $0x268] sm:$0xff] }
  0xcf   : > { %2407 = vmatpush1.bf16.msra.mxu1 %v2406_v32 }
  0xd0   : > { %2409 = vmatprep.subr.bf16.mxu1 %v2408_v39  ;;  %v1434_v39 = vld [vmem:[#allocation7 + $0x220] sm:$0xff] }
  0xd1   : > { %2235 = vmatmul.mubr.msk.f32.gmra.mrb[30].mxu1 %vm386_vm0, %v3244_v49  ;;  %2354 = vmatmul.mubr.msk.f32.gmra.mrb[30].mxu0 %vm386_vm0, %v3247_v50  ;;  %v1403_v49 = vld [vmem:[#allocation7 + $0x128] sm:$0xff] }
  0xd2   : > { %838 = vmatprep.mubr.f32.mxu1 %v3803_v0 }
  0xd3   : > { %2411 = vmatpush1.bf16.msra.mxu1 %v2410_v44 }
  0xd5   : > { %2236 = vmatmul.mubr.msk.f32.gmra.mrb[32].mxu1 %vm386_vm0, %v3211_v26  ;;  %v1385_v26 = vld [vmem:[#allocation7 + $0x98] sm:$0xff] }
  0xd6   : > { %844 = vmatprep.mubr.f32.mxu1 %v3803_v0  ;;  %v2500_v31 = vpack.c.bf16 %v1389_v28, %v1385_v26  ;;  %v1422_v26 = vld [vmem:[#allocation7 + $0x1c0] sm:$0xff]  ;;  %v2520_v28 = vpack.c.bf16 %v1429_v25, %v1425_v23 }
  0xd7   : > { %v2426_v29 = vpack.c.bf16 %v1426_v27, %v1422_v26  ;;  %v1462_v23 = vld [vmem:[#allocation7 + $0x300] sm:$0xff]  ;;  %v1464_v27 = vld [vmem:[#allocation7 + $0x310] sm:$0xff] }
  0xd8   : > { %2501 = vmatprep.subr.bf16.mxu0 %v2500_v31  ;;  %v1428_v31 = vld [vmem:[#allocation7 + $0x1f0] sm:$0xff] }
  0xd9   : > { %2237 = vmatmul.mubr.msk.f32.gmra.mrb[34].mxu1 %vm386_vm0, %v3222_v40  ;;  %2503 = vmatpush1.bf16.msra.mxu0 %v2502_v35  ;;  %v1397_v40 = vld [vmem:[#allocation7 + $0xf8] sm:$0xff]  ;;  %v2522_v32 = vpack.c.bf16 %v1428_v31, %v1424_v30  ;;  %v1471_v30 = vld [vmem:[#allocation7 + $0x348] sm:$0xff] }
  0xda   : > { %850 = vmatprep.mubr.f32.mxu1 %v3803_v0  ;;  %v2504_v43 = vpack.c.bf16 %v1397_v40, %v1393_v38  ;;  %v1433_v35 = vld [vmem:[#allocation7 + $0x218] sm:$0xff]  ;;  %v1430_v38 = vld [vmem:[#allocation7 + $0x200] sm:$0xff]  ;;  %v1475_v31 = vld [vmem:[#allocation7 + $0x368] sm:$0xff] }
  0xdb   : > { %v2524_v40 = vpack.c.bf16 %v1437_v37, %v1433_v35  ;;  %v2430_v41 = vpack.c.bf16 %v1434_v39, %v1430_v38  ;;  %v2448_v33 = vpack.c.bf16 %v1475_v31, %v1471_v30  ;;  %v1470_v35 = vld [vmem:[#allocation7 + $0x340] sm:$0xff]  ;;  %v1472_v39 = vld [vmem:[#allocation7 + $0x350] sm:$0xff] }
  0xdc   : > { %2505 = vmatprep.subr.bf16.mxu0 %v2504_v43  ;;  %v1436_v43 = vld [vmem:[#allocation7 + $0x230] sm:$0xff]  ;;  %v3364_v30 = vld [vmem:[#allocation7 + $0x400] sm:$0xff] }
  0xdd   : > { %2238 = vmatmul.mubr.msk.f32.gmra.mrb[36].mxu1 %vm386_vm0, %v3235_v48  ;;  %v1399_v48 = vld [vmem:[#allocation7 + $0x108] sm:$0xff]  ;;  %2507 = vmatpush1.bf16.msra.mxu0 %v2506_v47  ;;  %v2526_v44 = vpack.c.bf16 %v1436_v43, %v1432_v42  ;;  %v1441_v47 = vld [vmem:[#allocation7 + $0x258] sm:$0xff]  ;;  %v3366_v31 = vld [vmem:[#allocation7 + $0x420] sm:$0xff] }
  0xde   : > { %856 = vmatprep.mubr.f32.mxu1 %v3803_v0  ;;  %v2412_v51 = vpack.c.bf16 %v1403_v49, %v1399_v48  ;;  %v2432_v48 = vpack.c.bf16 %v1443_v46, %v1439_v45  ;;  %v1445_v49 = vld [vmem:[#allocation7 + $0x278] sm:$0xff]  ;;  %v1479_v42 = vld [vmem:[#allocation7 + $0x388] sm:$0xff] }
  0xdf   : > { %v1483_v43 = vld [vmem:[#allocation7 + $0x3a8] sm:$0xff]  ;;  %v1485_v46 = vld [vmem:[#allocation7 + $0x3b8] sm:$0xff] }
  0xe0   : > { %2413 = vmatprep.subr.bf16.mxu1 %v2412_v51  ;;  %v1442_v51 = vld [vmem:[#allocation7 + $0x260] sm:$0xff]  ;;  %v2452_v45 = vpack.c.bf16 %v1483_v43, %v1479_v42  ;;  %v3378_v42 = vld [vmem:[#allocation7 + $0x468] sm:$0xff] }
  0xe1   : > { %2239 = vmatmul.mubr.msk.f32.gmra.mrb[38].mxu1 %vm386_vm0, %v3247_v50  ;;  %v1401_v50 = vld [vmem:[#allocation7 + $0x118] sm:$0xff] }
  0xe2   : > { %v2508_v55 = vpack.c.bf16 %v1405_v52, %v1401_v50  ;;  %2415 = vmatpush1.bf16.msra.mxu1 %v2414_v56  ;;  %v1438_v50 = vld [vmem:[#allocation7 + $0x240] sm:$0xff]  ;;  %v2528_v52 = vpack.c.bf16 %v1445_v49, %v1441_v47 }
  0xe3   : > { %2417 = vmatprep.subr.bf16.mxu1 %v2416_v63  ;;  %v2434_v53 = vpack.c.bf16 %v1442_v51, %v1438_v50  ;;  %v1450_v63 = vld [vmem:[#allocation7 + $0x2a0] sm:$0xff]  ;;  %v1480_v51 = vld [vmem:[#allocation7 + $0x390] sm:$0xff] }
  0xe4   : > { %2509 = vmatprep.subr.bf16.mxu0 %v2508_v55  ;;  %v1444_v55 = vld [vmem:[#allocation7 + $0x270] sm:$0xff]  ;;  %v2438_v2 = vpack.c.bf16 %v1450_v63, %v1446_v62  ;;  %v1478_v47 = vld [vmem:[#allocation7 + $0x380] sm:$0xff] }
  0xe5   : > { %2511 = vmatpush1.bf16.msra.mxu0 %v2510_v59  ;;  %v2530_v56 = vpack.c.bf16 %v1444_v55, %v1440_v54  ;;  %v1449_v59 = vld [vmem:[#allocation7 + $0x298] sm:$0xff]  ;;  %v1487_v54 = vld [vmem:[#allocation7 + $0x3c8] sm:$0xff]  ;;  %v1488_v63 = vld [vmem:[#allocation7 + $0x3d0] sm:$0xff] }
  0xe6   : > { %2513 = vmatprep.subr.bf16.mxu0 %v2512_v4  ;;  %2419 = vmatpush1.bf16.msra.mxu1 %v2418_v5  ;;  %v2532_v1 = vpack.c.bf16 %v1453_v61, %v1449_v59  ;;  %v1452_v4 = vld [vmem:[#allocation7 + $0x2b0] sm:$0xff]  ;;  %v1491_v55 = vld [vmem:[#allocation7 + $0x3e8] sm:$0xff]  ;;  %v1486_v59 = vld [vmem:[#allocation7 + $0x3c0] sm:$0xff] }
  0xe7   : > { %2421 = vmatprep.subr.bf16.mxu1 %v2420_v12  ;;  %v2534_v5 = vpack.c.bf16 %v1452_v4, %v1448_v3  ;;  %v1458_v12 = vld [vmem:[#allocation7 + $0x2e0] sm:$0xff]  ;;  %v2456_v57 = vpack.c.bf16 %v1491_v55, %v1487_v54  ;;  %v1495_v3 = vld [vmem:[#allocation7 + $0x408] sm:$0xff] }
  0xe8   : > { %v2442_v14 = vpack.c.bf16 %v1458_v12, %v1454_v11  ;;  %v1499_v4 = vld [vmem:[#allocation7 + $0x428] sm:$0xff]  ;;  %v3398_v55 = vld [vmem:[#allocation7 + $0x440] sm:$0xff] }
  0xe9   : > { %2515 = vmatpush1.bf16.msra.mxu0 %v2514_v8  ;;  %v1457_v8 = vld [vmem:[#allocation7 + $0x2d8] sm:$0xff]  ;;  %v2460_v6 = vpack.c.bf16 %v1499_v4, %v1495_v3 }
  0xea   : > { %2517 = vmatprep.subr.bf16.mxu0 %v2516_v16  ;;  %2423 = vmatpush1.bf16.msra.mxu1 %v2422_v17  ;;  %v2536_v13 = vpack.c.bf16 %v1461_v10, %v1457_v8  ;;  %v1460_v16 = vld [vmem:[#allocation7 + $0x2f0] sm:$0xff] }
  0xeb   : > { %2425 = vmatprep.subr.bf16.mxu1 %v2424_v24  ;;  %v2538_v17 = vpack.c.bf16 %v1460_v16, %v1456_v15  ;;  %v1466_v24 = vld [vmem:[#allocation7 + $0x320] sm:$0xff] }
  0xec   : > { %v2446_v26 = vpack.c.bf16 %v1466_v24, %v1462_v23  ;;  %v1343_v24 = vld [vmem:[%s3792_s2] sm:$0x7] }
  0xed   : > { %2519 = vmatpush1.bf16.msra.mxu0 %v2518_v20  ;;  %v1465_v20 = vld [vmem:[#allocation7 + $0x318] sm:$0xff] }
  0xee   : > { %2521 = vmatprep.subr.bf16.mxu0 %v2520_v28  ;;  %2427 = vmatpush1.bf16.msra.mxu1 %v2426_v29  ;;  %v2540_v25 = vpack.c.bf16 %v1469_v22, %v1465_v20  ;;  %v1468_v28 = vld [vmem:[#allocation7 + $0x330] sm:$0xff] }
  0xef   : > { %2429 = vmatprep.subr.bf16.mxu1 %v2428_v36  ;;  %v2542_v29 = vpack.c.bf16 %v1468_v28, %v1464_v27  ;;  %v1474_v36 = vld [vmem:[#allocation7 + $0x360] sm:$0xff] }
  0xf0   : > { %v2450_v38 = vpack.c.bf16 %v1474_v36, %v1470_v35  ;;  %v3368_v36 = vld [vmem:[#allocation7 + $0x410] sm:$0xff] }
  0xf1   : > { %2523 = vmatpush1.bf16.msra.mxu0 %v2522_v32  ;;  %v1473_v32 = vld [vmem:[#allocation7 + $0x358] sm:$0xff] }
  0xf2   : > { %2525 = vmatprep.subr.bf16.mxu0 %v2524_v40  ;;  %2431 = vmatpush1.bf16.msra.mxu1 %v2430_v41  ;;  %v2544_v37 = vpack.c.bf16 %v1477_v34, %v1473_v32  ;;  %v1476_v40 = vld [vmem:[#allocation7 + $0x370] sm:$0xff] }
  0xf3   : > { %2433 = vmatprep.subr.bf16.mxu1 %v2432_v48  ;;  %v2546_v41 = vpack.c.bf16 %v1476_v40, %v1472_v39  ;;  %v1482_v48 = vld [vmem:[#allocation7 + $0x3a0] sm:$0xff]  ;;  %v3374_v40 = vld [vmem:[#allocation7 + $0x430] sm:$0xff] }
  0xf4   : > { %v2454_v50 = vpack.c.bf16 %v1482_v48, %v1478_v47  ;;  %v3390_v47 = vld [vmem:[#allocation7 + $0x458] sm:$0xff] }
  0xf5   : > { %2527 = vmatpush1.bf16.msra.mxu0 %v2526_v44  ;;  %v1481_v44 = vld [vmem:[#allocation7 + $0x398] sm:$0xff] }
  0xf6   : > { %2529 = vmatprep.subr.bf16.mxu0 %v2528_v52  ;;  %2435 = vmatpush1.bf16.msra.mxu1 %v2434_v53  ;;  %v2548_v49 = vpack.c.bf16 %v1485_v46, %v1481_v44  ;;  %v1484_v52 = vld [vmem:[#allocation7 + $0x3b0] sm:$0xff]  ;;  %v3392_v48 = vld [vmem:[#allocation7 + $0x478] sm:$0xff] }
  0xf7   : > { %2437 = vmatprep.subr.bf16.mxu1 %v2436_v60  ;;  %v2550_v53 = vpack.c.bf16 %v1484_v52, %v1480_v51  ;;  %v1490_v60 = vld [vmem:[#allocation7 + $0x3e0] sm:$0xff] }
  0xf8   : > { %v2458_v62 = vpack.c.bf16 %v1490_v60, %v1486_v59 }
  0xf9   : > { %2531 = vmatpush1.bf16.msra.mxu0 %v2530_v56  ;;  %v1489_v56 = vld [vmem:[#allocation7 + $0x3d8] sm:$0xff] }
  0xfa   : > { %2533 = vmatprep.subr.bf16.mxu0 %v2532_v1  ;;  %2439 = vmatpush1.bf16.msra.mxu1 %v2438_v2  ;;  %v2552_v61 = vpack.c.bf16 %v1493_v58, %v1489_v56  ;;  %v1492_v1 = vld [vmem:[#allocation7 + $0x3f0] sm:$0xff]  ;;  %v3400_v56 = vld [vmem:[#allocation7 + $0x460] sm:$0xff] }
  0xfb   : > { %2441 = vmatprep.subr.bf16.mxu1 %v2440_v9  ;;  %v2554_v2 = vpack.c.bf16 %v1492_v1, %v1488_v63  ;;  %v976_v9 = vlaneseq }
  0xfd   : > { %2535 = vmatpush1.bf16.msra.mxu0 %v2534_v5  ;;  %v1497_v5 = vld [vmem:[#allocation7 + $0x418] sm:$0xff] }
  0xfe   : > { %2537 = vmatprep.subr.bf16.mxu0 %v2536_v13  ;;  %2443 = vmatpush1.bf16.msra.mxu1 %v2442_v14  ;;  %v2556_v8 = vpack.c.bf16 %v1501_v7, %v1497_v5  ;;  %v3345_v14 = vshrl.u32 %v976_v9, 7 }
  0xff   : > { %2445 = vmatprep.subr.bf16.mxu1 %v2444_v21 }
 0x100   : > { %vm978_vm1 = vcmp.lt.s32.totalorder %v3345_v14, 7  ;;  %v3802_v23 = vsub.s32 0, %v3345_v14  ;;  %vm995_vm2 = vcmp.le.s32.totalorder %v3345_v14, 6  ;;  %vm1084_vm4 = vcmp.lt.s32.totalorder %v3345_v14, 6 }
 0x101   : > { %2539 = vmatpush1.bf16.msra.mxu0 %v2538_v17  ;;  %vm1101_vm5 = vcmp.le.s32.totalorder %v3345_v14, 5  ;;  %vm1214_vm12 = vcmp.lt.s32.totalorder %v3345_v14, 5  ;;  %vm1231_vm13 = vcmp.le.s32.totalorder %v3345_v14, 4 }
 0x102   : > { %2541 = vmatprep.subr.bf16.mxu0 %v2540_v25  ;;  %2447 = vmatpush1.bf16.msra.mxu1 %v2446_v26  ;;  %v3801_v25 = vsub.s32 1, %v3345_v14  ;;  %v3372_v39 = vrot.slane %v1343_v24, %v3802_v23 }
 0x103   : > { %2449 = vmatprep.subr.bf16.mxu1 %v2448_v33 }
 0x105   : > { %2543 = vmatpush1.bf16.msra.mxu0 %v2542_v29 }
 0x106   : > { %2545 = vmatprep.subr.bf16.mxu0 %v2544_v37  ;;  %2451 = vmatpush1.bf16.msra.mxu1 %v2450_v38 }
 0x107   : > { %2453 = vmatprep.subr.bf16.mxu1 %v2452_v45  ;;  %v3386_v45 = vrot.slane %v1343_v24, %v3801_v25 }
 0x109   : > { %2547 = vmatpush1.bf16.msra.mxu0 %v2546_v41  ;;  %v3376_v41 = vld [vmem:[#allocation7 + $0x448] sm:$0xff] }
 0x10a   : > { %2549 = vmatprep.subr.bf16.mxu0 %v2548_v49  ;;  %2455 = vmatpush1.bf16.msra.mxu1 %v2454_v50 }
 0x10b   : > { %2457 = vmatprep.subr.bf16.mxu1 %v2456_v57 }
 0x10d   : > { %2551 = vmatpush1.bf16.msra.mxu0 %v2550_v53 }
 0x10e   : > { %2553 = vmatprep.subr.bf16.mxu0 %v2552_v61  ;;  %2459 = vmatpush1.bf16.msra.mxu1 %v2458_v62 }
 0x10f   : > { %2461 = vmatprep.subr.bf16.mxu1 %v2460_v6 }
 0x111   : > { %2555 = vmatpush1.bf16.msra.mxu0 %v2554_v2 }
 0x112   : > { %2557 = vmatprep.subr.bf16.mxu0 %v2556_v8 }
 0x168   : > { %v501_v10 = vpop.f32.mrb[0].mxu1  ;;  %v477_v11 = vpop.f32.mrb[0].mxu0 }
 0x169   : > { %v3341_v12 = vpop.f32.mrb[1].mxu1  ;;  %v3343_v13 = vpop.f32.mrb[1].mxu0 }
 0x16a   : > { %v968_v15 = vrot.slane %v3343_v13, 1  ;;  %v972_v20 = vrot.slane %v3341_v12, 1 }
 0x16c   : > { %v483_v16 = vpop.f32.mrb[2].mxu0  ;;  %v507_v17 = vpop.f32.mrb[2].mxu1 }
 0x16d   : > { %v485_v18 = vpop.f32.mrb[3].mxu0  ;;  %v509_v19 = vpop.f32.mrb[3].mxu1 }
 0x16e   : > { %v969_v21 = vrot.slane %v485_v18, 1  ;;  %v973_v22 = vrot.slane %v509_v19, 1 }
 0x170   : > { %v985_v26 = vsel %vm978_vm1, %v968_v15, %v969_v21  ;;  %v981_v27 = vsel %vm978_vm1, %v972_v20, %v973_v22  ;;  %v489_v28 = vpop.f32.mrb[4].mxu0  ;;  %v3362_v29 = vpop.f32.mrb[4].mxu1 }
 0x171   : > { %v987_v32 = vadd.f32 %v985_v26, %v477_v11  ;;  %v991_v33 = vadd.f32 %v981_v27, %v501_v10  ;;  %v491_v34 = vpop.f32.mrb[5].mxu0  ;;  %v515_v35 = vpop.f32.mrb[5].mxu1 }
 0x172   : > { %v970_v37 = vrot.slane %v491_v34, 1  ;;  %v974_v38 = vrot.slane %v515_v35, 1  ;;  %v3434_v34 = vld [vmem:[#allocation7 + $0x470] sm:$0xff] }
 0x173   : > { %v996_v43 = vsel %vm995_vm2, %v987_v32, -1e+30  ;;  %v1000_v44 = vsel %vm995_vm2, %v991_v33, -1e+30 }
 0x174   : > { %v1004_v49 = vrot.slane %v996_v43, 4  ;;  %v1028_v50 = vrot.slane %v1000_v44, 4  ;;  %v984_v51 = vsel %vm978_vm1, %v969_v21, %v970_v37  ;;  %v980_v52 = vsel %vm978_vm1, %v973_v22, %v974_v38  ;;  %v495_v53 = vpop.f32.mrb[6].mxu0  ;;  %v519_v54 = vpop.f32.mrb[6].mxu1 }
 0x175   : > { %v988_v57 = vadd.f32 %v984_v51, %v483_v16  ;;  %v992_v58 = vadd.f32 %v980_v52, %v507_v17  ;;  %v497_v59 = vpop.f32.mrb[7].mxu0  ;;  %v521_v60 = vpop.f32.mrb[7].mxu1 }
 0x176   : > { %v1005_v63 = vmax.f32 %v996_v43, %v1004_v49  ;;  %v1029_v1 = vmax.f32 %v1000_v44, %v1028_v50  ;;  %v971_v2 = vrot.slane %v497_v59, 1  ;;  %v975_v3 = vrot.slane %v521_v60, 1 }
 0x177   : > { %v997_v4 = vsel %vm995_vm2, %v988_v57, -1e+30  ;;  %v1001_v5 = vsel %vm995_vm2, %v992_v58, -1e+30 }
 0x178   : > { %v1006_v8 = vrot.slane %v1005_v63, 2  ;;  %v1030_v9 = vrot.slane %v1029_v1, 2  ;;  %v1010_v10 = vrot.slane %v997_v4, 4  ;;  %v1034_v11 = vrot.slane %v1001_v5, 4  ;;  %v3414_v12 = vpop.f32.mrb[8].mxu1  ;;  %v3416_v16 = vpop.f32.mrb[8].mxu0 }
 0x179   : > { %v982_v17 = vsel %vm978_vm1, %v971_v2, %v972_v20  ;;  %v983_v18 = vsel %vm978_vm1, %v970_v37, %v971_v2  ;;  %v979_v19 = vsel %vm978_vm1, %v974_v38, %v975_v3  ;;  %v986_v21 = vsel %vm978_vm1, %v975_v3, %v968_v15  ;;  %v3428_v22 = vpop.f32.mrb[9].mxu1  ;;  %v3430_v24 = vpop.f32.mrb[9].mxu0  ;;  %v3432_v20 = vld [vmem:[#allocation7 + $0x450] sm:$0xff] }
 0x17a   : > { %v1007_v26 = vmax.f32 %v1005_v63, %v1006_v8  ;;  %v1031_v27 = vmax.f32 %v1029_v1, %v1030_v9  ;;  %v1011_v32 = vmax.f32 %v997_v4, %v1010_v10  ;;  %v1035_v33 = vmax.f32 %v1001_v5, %v1034_v11 }
 0x17b   : > { %v989_v35 = vadd.f32 %v983_v18, %v489_v28  ;;  %v990_v37 = vadd.f32 %v982_v17, %v495_v53  ;;  %v993_v38 = vadd.f32 %v979_v19, %v3362_v29  ;;  %v994_v13 = vadd.f32 %v986_v21, %v519_v54 }
 0x17c   : > { %v1008_v15 = vrot.slane %v1007_v26, 1  ;;  %v1032_v43 = vrot.slane %v1031_v27, 1  ;;  %v1012_v44 = vrot.slane %v1011_v32, 2  ;;  %v1036_v49 = vrot.slane %v1035_v33, 2  ;;  %v596_v50 = vpop.f32.mrb[10].mxu1  ;;  %v3438_v51 = vpop.f32.mrb[10].mxu0 }
 0x17d   : > { %v998_v52 = vsel %vm995_vm2, %v989_v35, -1e+30  ;;  %v999_v57 = vsel %vm995_vm2, %v990_v37, -1e+30  ;;  %v1002_v28 = vsel %vm995_vm2, %v993_v38, -1e+30 }
 0x17e   : > { %v1009_v53 = vmax.f32 %v1007_v26, %v1008_v15  ;;  %v3448_v54 = vmax.f32 %v1031_v27, %v1032_v43  ;;  %v1013_v58 = vmax.f32 %v1011_v32, %v1012_v44  ;;  %v1037_v59 = vmax.f32 %v1035_v33, %v1036_v49  ;;  %v598_v60 = vpop.f32.mrb[11].mxu1  ;;  %v3451_v63 = vpop.f32.mrb[11].mxu0 }
 0x17f   : > { %v1016_v1 = vrot.slane %v998_v52, 4  ;;  %v1022_v2 = vrot.slane %v999_v57, 4  ;;  %v1003_v3 = vsel %vm995_vm2, %v994_v13, -1e+30  ;;  %v1040_v4 = vrot.slane %v1002_v28, 4 }
 0x180   : > { %v1014_v5 = vrot.slane %v1013_v58, 1  ;;  %v1038_v8 = vrot.slane %v1037_v59, 1  ;;  %v1046_v9 = vrot.slane %v1003_v3, 4  ;;  %v1052_v10 = vrot.slane %v3428_v22, 1  ;;  %v602_v11 = vpop.f32.mrb[12].mxu1  ;;  %v3456_v17 = vpop.f32.mrb[12].mxu0 }
 0x181   : > { %v1017_v18 = vmax.f32 %v998_v52, %v1016_v1  ;;  %v1023_v19 = vmax.f32 %v999_v57, %v1022_v2  ;;  %v1041_v21 = vmax.f32 %v1002_v28, %v1040_v4  ;;  %v1076_v26 = vrot.slane %v3416_v16, 2  ;;  %v604_v27 = vpop.f32.mrb[13].mxu1  ;;  %v3459_v32 = vpop.f32.mrb[13].mxu0 }
 0x182   : > { %v1015_v33 = vmax.f32 %v1013_v58, %v1014_v5  ;;  %v3461_v35 = vmax.f32 %v1037_v59, %v1038_v8  ;;  %v1047_v37 = vmax.f32 %v1003_v3, %v1046_v9  ;;  %v1053_v38 = vrot.slane %v598_v60, 1 }
 0x183   : > { %v1018_v13 = vrot.slane %v1017_v18, 2  ;;  %v1024_v15 = vrot.slane %v1023_v19, 2  ;;  %v1042_v43 = vrot.slane %v1041_v21, 2  ;;  %v1077_v44 = vrot.slane %v3438_v51, 2 }
 0x184   : > { %v1297_v49 = vsel %vm1296_vm3, %v1015_v33, %v1009_v53  ;;  %v1048_v52 = vrot.slane %v1047_v37, 2  ;;  %v1066_v57 = vsel %vm978_vm1, %v1052_v10, %v1053_v38  ;;  %v1054_v28 = vrot.slane %v604_v27, 1  ;;  %v608_v1 = vpop.f32.mrb[14].mxu1  ;;  %v721_v58 = vpop.f32.mrb[14].mxu0 }
 0x185   : > { %v1019_v59 = vmax.f32 %v1017_v18, %v1018_v13  ;;  %v1025_v2 = vmax.f32 %v1023_v19, %v1024_v15  ;;  %v1043_v60 = vmax.f32 %v1041_v21, %v1042_v43  ;;  %v1068_v3 = vadd.f32 %v1066_v57, %v3414_v12  ;;  %v610_v4 = vpop.f32.mrb[15].mxu1  ;;  %v3470_v5 = vpop.f32.mrb[15].mxu0 }
 0x186   : > { %v1049_v51 = vmax.f32 %v1047_v37, %v1048_v52  ;;  %v1091_v53 = vsel %vm1084_vm4, %v1076_v26, %v1077_v44  ;;  %v1065_v8 = vsel %vm978_vm1, %v1053_v38, %v1054_v28  ;;  %v1078_v9 = vrot.slane %v3456_v17, 2 }
 0x187   : > { %v1020_v18 = vrot.slane %v1019_v59, 1  ;;  %v1026_v19 = vrot.slane %v1025_v2, 1  ;;  %v1044_v21 = vrot.slane %v1043_v60, 1  ;;  %v1093_v27 = vadd.f32 %v1091_v53, %v1068_v3 }
 0x188   : > { %v1050_v12 = vrot.slane %v1049_v51, 1  ;;  %v1069_v33 = vadd.f32 %v1065_v8, %v596_v50  ;;  %v1090_v13 = vsel %vm1084_vm4, %v1077_v44, %v1078_v9  ;;  %v1055_v37 = vrot.slane %v610_v4, 1  ;;  %v614_v15 = vpop.f32.mrb[16].mxu1  ;;  %v727_v43 = vpop.f32.mrb[16].mxu0 }
 0x189   : > { %v1021_v52 = vmax.f32 %v1019_v59, %v1020_v18  ;;  %v1027_v57 = vmax.f32 %v1025_v2, %v1026_v19  ;;  %v1045_v25 = vmax.f32 %v1043_v60, %v1044_v21  ;;  %v1102_v38 = vsel %vm1101_vm5, %v1093_v27, -1e+30  ;;  %v616_v23 = vpop.f32.mrb[17].mxu1  ;;  %v3483_v17 = vpop.f32.mrb[17].mxu0 }
 0x18a   : > { %v3485_v29 = vmax.f32 %v1049_v51, %v1050_v12  ;;  %v1110_v3 = vrot.slane %v1102_v38, 4  ;;  %v1094_v50 = vadd.f32 %v1090_v13, %v1069_v33  ;;  %v1064_v44 = vsel %vm978_vm1, %v1054_v28, %v1055_v37 }
 0x18b   : > { %v1299_v4 = vsel %vm1298_vm6, %v1021_v52, %v1297_v49  ;;  %v1070_v53 = vadd.f32 %v1064_v44, %v602_v11  ;;  %v1079_v59 = vrot.slane %v721_v58, 2  ;;  %v1056_v2 = vrot.slane %v616_v23, 1 }
 0x18c   : > { %v1111_v60 = vmax.f32 %v1102_v38, %v1110_v3  ;;  %v1103_v8 = vsel %vm1101_vm5, %v1094_v50, -1e+30  ;;  %v1080_v18 = vrot.slane %v727_v43, 2  ;;  %v620_v19 = vpop.f32.mrb[18].mxu1  ;;  %v733_v21 = vpop.f32.mrb[18].mxu0  ;;  %v1301_v51 = vsel %vm1300_vm7, %v1027_v57, %v1299_v4 }
 0x18d   : > { %v1116_v27 = vrot.slane %v1103_v8, 4  ;;  %v1089_v12 = vsel %vm1084_vm4, %v1078_v9, %v1079_v59  ;;  %v1063_v49 = vsel %vm978_vm1, %v1055_v37, %v1056_v2  ;;  %v622_v11 = vpop.f32.mrb[19].mxu1  ;;  %v1081_v28 = vrot.slane %v733_v21, 2  ;;  %v3497_v23 = vpop.f32.mrb[19].mxu0 }
 0x18e   : > { %v1112_v58 = vrot.slane %v1111_v60, 2  ;;  %v1095_v33 = vadd.f32 %v1089_v12, %v1070_v53  ;;  %v1071_v13 = vadd.f32 %v1063_v49, %v608_v1  ;;  %v1088_v43 = vsel %vm1084_vm4, %v1079_v59, %v1080_v18 }
 0x18f   : > { %v1117_v52 = vmax.f32 %v1103_v8, %v1116_v27  ;;  %v1057_v38 = vrot.slane %v622_v11, 1  ;;  %v1087_v57 = vsel %vm1084_vm4, %v1080_v18, %v1081_v28  ;;  %v1303_v9 = vsel %vm1302_vm8, %v3448_v54, %v1301_v51 }
 0x190   : > { %v1113_v3 = vmax.f32 %v1111_v60, %v1112_v58  ;;  %v1104_v37 = vsel %vm1101_vm5, %v1095_v33, -1e+30  ;;  %v1096_v50 = vadd.f32 %v1088_v43, %v1071_v13  ;;  %v626_v44 = vpop.f32.mrb[20].mxu1  ;;  %v739_v4 = vpop.f32.mrb[20].mxu0  ;;  %v1305_v1 = vsel %vm1304_vm9, %v3461_v35, %v1303_v9 }
 0x191   : > { %v1118_v53 = vrot.slane %v1117_v52, 2  ;;  %v1122_v59 = vrot.slane %v1104_v37, 4  ;;  %v1062_v8 = vsel %vm978_vm1, %v1056_v2, %v1057_v38  ;;  %v628_v21 = vpop.f32.mrb[21].mxu1  ;;  %v1082_v18 = vrot.slane %v739_v4, 2  ;;  %v3511_v27 = vpop.f32.mrb[21].mxu0 }
 0x192   : > { %v1114_v54 = vrot.slane %v1113_v3, 1  ;;  %v1105_v60 = vsel %vm1101_vm5, %v1096_v50, -1e+30  ;;  %v1072_v51 = vadd.f32 %v1062_v8, %v614_v15  ;;  %v1058_v12 = vrot.slane %v628_v21, 1 }
 0x193   : > { %v1119_v49 = vmax.f32 %v1117_v52, %v1118_v53  ;;  %v1123_v11 = vmax.f32 %v1104_v37, %v1122_v59  ;;  %v1128_v58 = vrot.slane %v1105_v60, 4  ;;  %v1086_v35 = vsel %vm1084_vm4, %v1081_v28, %v1082_v18 }
 0x194   : > { %v1115_v33 = vmax.f32 %v1113_v3, %v1114_v54  ;;  %v1097_v13 = vadd.f32 %v1087_v57, %v1072_v51  ;;  %v1061_v2 = vsel %vm978_vm1, %v1057_v38, %v1058_v12  ;;  %v632_v43 = vpop.f32.mrb[22].mxu1  ;;  %v745_v9 = vpop.f32.mrb[22].mxu0  ;;  %v1307_v4 = vsel %vm1306_vm10, %v1045_v25, %v1305_v1 }
 0x195   : > { %v1120_v7 = vrot.slane %v1119_v49, 1  ;;  %v1124_v0 = vrot.slane %v1123_v11, 2  ;;  %v1129_v50 = vmax.f32 %v1105_v60, %v1128_v58  ;;  %v1073_v15 = vadd.f32 %v1061_v2, %v620_v19  ;;  %v634_v8 = vpop.f32.mrb[23].mxu1  ;;  %v3520_v52 = vpop.f32.mrb[23].mxu0 }
 0x196   : > { %v1106_v28 = vsel %vm1101_vm5, %v1097_v13, -1e+30  ;;  %v1083_v57 = vrot.slane %v745_v9, 2  ;;  %v1059_v3 = vrot.slane %v634_v8, 1  ;;  %v3527_v38 = vsel %vm1308_vm11, %v3485_v29, %v1307_v4 }
 0x197   : > { %v1121_v37 = vmax.f32 %v1119_v49, %v1120_v7  ;;  %v1125_v25 = vmax.f32 %v1123_v11, %v1124_v0  ;;  %v1130_v1 = vrot.slane %v1129_v50, 2  ;;  %v1134_v53 = vrot.slane %v1106_v28, 4 }
 0x198   : > { %v1098_v59 = vadd.f32 %v1086_v35, %v1073_v15  ;;  %v1085_v19 = vsel %vm1084_vm4, %v1082_v18, %v1083_v57  ;;  %v1092_v21 = vsel %vm1084_vm4, %v1083_v57, %v1076_v26  ;;  %v1060_v54 = vsel %vm978_vm1, %v1058_v12, %v1059_v3  ;;  %v3537_v60 = vpop.f32.mrb[24].mxu1  ;;  %v3539_v29 = vpop.f32.mrb[24].mxu0 }
 0x199   : > { %v3542_v0 = vsel %vm1296_vm3, %v1121_v37, %v1115_v33  ;;  %v1126_v7 = vrot.slane %v1125_v25, 1  ;;  %v1131_v51 = vmax.f32 %v1129_v50, %v1130_v1  ;;  %v1135_v49 = vmax.f32 %v1106_v28, %v1134_v53  ;;  %v3544_v11 = vpop.f32.mrb[25].mxu1  ;;  %v3546_v18 = vpop.f32.mrb[25].mxu0 }
 0x19a   : > { %v1107_v16 = vsel %vm1101_vm5, %v1098_v59, -1e+30  ;;  %v1067_v26 = vsel %vm978_vm1, %v1059_v3, %v1052_v10  ;;  %v1074_v12 = vadd.f32 %v1060_v54, %v626_v44  ;;  %v3806_v58 = vrot.slane %v3537_v60, 1 }
 0x19b   : > { %v3555_v35 = vmax.f32 %v1125_v25, %v1126_v7  ;;  %v1132_v33 = vrot.slane %v1131_v51, 1  ;;  %v1136_v13 = vrot.slane %v1135_v49, 2  ;;  %v1140_v2 = vrot.slane %v1107_v16, 4 }
 0x19c   : > { %v1075_v9 = vadd.f32 %v1067_v26, %v632_v43  ;;  %v1099_v4 = vadd.f32 %v1085_v19, %v1074_v12  ;;  %v3805_v50 = vrot.slane %v3544_v11, 2  ;;  %v822_v15 = vpop.f32.mrb[26].mxu1  ;;  %v1207_v22 = vrot.slane %v3539_v29, 3  ;;  %v3560_v8 = vpop.f32.mrb[26].mxu0 }
 0x19d   : > { %v3562_v10 = vmax.f32 %v1131_v51, %v1132_v33  ;;  %v1137_v44 = vmax.f32 %v1135_v49, %v1136_v13  ;;  %v1141_v28 = vmax.f32 %v1107_v16, %v1140_v2  ;;  %v1159_v57 = vrot.slane %v822_v15, 1  ;;  %v824_v3 = vpop.f32.mrb[27].mxu1  ;;  %v939_v37 = vpop.f32.mrb[27].mxu0 }
 0x19e   : > { %v1100_v25 = vadd.f32 %v1092_v21, %v1075_v9  ;;  %v1108_v1 = vsel %vm1101_vm5, %v1099_v4, -1e+30  ;;  %v1183_v43 = vrot.slane %v824_v3, 2  ;;  %v1206_v53 = vrot.slane %v3546_v18, 3 }
 0x19f   : > { %v1138_v59 = vrot.slane %v1137_v44, 1  ;;  %v1142_v19 = vrot.slane %v1141_v28, 2  ;;  %v1146_v54 = vrot.slane %v1108_v1, 4  ;;  %v1172_v29 = vsel %vm978_vm1, %v3806_v58, %v1159_v57 }
 0x1a0   : > { %v1109_v7 = vsel %vm1101_vm5, %v1100_v25, -1e+30  ;;  %v1174_v51 = vadd.f32 %v1172_v29, %v3430_v24  ;;  %v1196_v21 = vsel %vm1084_vm4, %v3805_v50, %v1183_v43  ;;  %v828_v49 = vpop.f32.mrb[28].mxu1  ;;  %v1221_v16 = vsel %vm1214_vm12, %v1206_v53, %v1207_v22  ;;  %v3582_v26 = vpop.f32.mrb[28].mxu0 }
 0x1a1   : > { %v3584_v12 = vmax.f32 %v1137_v44, %v1138_v59  ;;  %v1143_v33 = vmax.f32 %v1141_v28, %v1142_v19  ;;  %v1147_v13 = vmax.f32 %v1108_v1, %v1146_v54  ;;  %v1152_v2 = vrot.slane %v1109_v7, 4  ;;  %v830_v9 = vpop.f32.mrb[29].mxu1  ;;  %v949_v24 = vpop.f32.mrb[29].mxu0 }
 0x1a2   : > { %v1198_v4 = vadd.f32 %v1196_v21, %v1174_v51  ;;  %v1160_v15 = vrot.slane %v828_v49, 1  ;;  %v1184_v3 = vrot.slane %v830_v9, 2  ;;  %v1209_v25 = vrot.slane %v3560_v8, 3 }
 0x1a3   : > { %v1144_v29 = vrot.slane %v1143_v33, 1  ;;  %v1148_v6 = vrot.slane %v1147_v13, 2  ;;  %v1153_v62 = vmax.f32 %v1109_v7, %v1152_v2  ;;  %v1208_v61 = vrot.slane %v939_v37, 3 }
 0x1a4   : > { %v1171_v46 = vsel %vm978_vm1, %v1159_v57, %v1160_v15  ;;  %v1223_v50 = vadd.f32 %v1221_v16, %v1198_v4  ;;  %v1195_v44 = vsel %vm1084_vm4, %v1183_v43, %v1184_v3  ;;  %v834_v28 = vpop.f32.mrb[30].mxu1  ;;  %v1211_v1 = vrot.slane %v3582_v26, 3  ;;  %v3592_v59 = vpop.f32.mrb[30].mxu0  ;;  %v1511_v26 = vld [vmem:[#allocation7 + $0x488] sm:$0xff] }
 0x1a5   : > { %v3594_v19 = vmax.f32 %v1143_v33, %v1144_v29  ;;  %v1149_v54 = vmax.f32 %v1147_v13, %v1148_v6  ;;  %v1154_v8 = vrot.slane %v1153_v62, 2  ;;  %v1175_v51 = vadd.f32 %v1171_v46, %v3451_v63  ;;  %v836_v7 = vpop.f32.mrb[31].mxu1  ;;  %v3597_v37 = vpop.f32.mrb[31].mxu0 }
 0x1a6   : > { %v1232_v57 = vsel %vm1231_vm13, %v1223_v50, -1e+30  ;;  %v1161_v21 = vrot.slane %v834_v28, 1  ;;  %v1219_v43 = vsel %vm1214_vm12, %v1208_v61, %v1209_v25  ;;  %v1220_v49 = vsel %vm1214_vm12, %v1207_v22, %v1208_v61 }
 0x1a7   : > { %v1240_v16 = vrot.slane %v1232_v57, 4  ;;  %v1199_v33 = vadd.f32 %v1195_v44, %v1175_v51  ;;  %v1185_v2 = vrot.slane %v836_v7, 2  ;;  %v1210_v6 = vrot.slane %v949_v24, 3 }
 0x1a8   : > { %v1170_v46 = vsel %vm978_vm1, %v1160_v15, %v1161_v21  ;;  %v840_v63 = vpop.f32.mrb[32].mxu1  ;;  %v1213_v13 = vrot.slane %v3592_v59, 3  ;;  %v1150_v9 = vrot.slane %v1149_v54, 1  ;;  %v1155_v4 = vmax.f32 %v1153_v62, %v1154_v8 }
 0x1a9   : > { %v1241_v50 = vmax.f32 %v1232_v57, %v1240_v16  ;;  %v1176_v29 = vadd.f32 %v1170_v46, %v3459_v32  ;;  %v1224_v28 = vadd.f32 %v1220_v49, %v1199_v33  ;;  %v1194_v58 = vsel %vm1084_vm4, %v1184_v3, %v1185_v2  ;;  %v842_v61 = vpop.f32.mrb[33].mxu1 }
 0x1aa   : > { %v1162_v22 = vrot.slane %v840_v63, 1  ;;  %v1186_v44 = vrot.slane %v842_v61, 2  ;;  %v1217_v24 = vsel %vm1214_vm12, %v1210_v6, %v1211_v1  ;;  %v1218_v15 = vsel %vm1214_vm12, %v1209_v25, %v1210_v6 }
 0x1ab   : > { %v1242_v51 = vrot.slane %v1241_v50, 2  ;;  %v1233_v62 = vsel %vm1231_vm13, %v1224_v28, -1e+30  ;;  %v1200_v32 = vadd.f32 %v1194_v58, %v1176_v29  ;;  %v3625_v3 = vsel %vm1214_vm12, %v1213_v13, %v1206_v53 }
 0x1ac   : > { %v1246_v8 = vrot.slane %v1233_v62, 4  ;;  %v1169_v7 = vsel %vm978_vm1, %v1161_v21, %v1162_v22  ;;  %v1193_v25 = vsel %vm1084_vm4, %v1185_v2, %v1186_v44  ;;  %v846_v57 = vpop.f32.mrb[34].mxu1  ;;  %v1151_v49 = vmax.f32 %v1149_v54, %v1150_v9 }
 0x1ad   : > { %v1243_v16 = vmax.f32 %v1241_v50, %v1242_v51  ;;  %v1225_v33 = vadd.f32 %v1219_v43, %v1200_v32  ;;  %v1177_v58 = vadd.f32 %v1169_v7, %v3470_v5  ;;  %v1163_v18 = vrot.slane %v846_v57, 1  ;;  %v848_v6 = vpop.f32.mrb[35].mxu1 }
 0x1ae   : > { %v1247_v46 = vmax.f32 %v1233_v62, %v1246_v8  ;;  %v1187_v63 = vrot.slane %v848_v6, 2  ;;  %v1156_v29 = vrot.slane %v1155_v4, 1  ;;  %v1320_v53 = vsel %vm1298_vm6, %v3555_v35, %v3542_v0 }
 0x1af   : > { %v1244_v28 = vrot.slane %v1243_v16, 1  ;;  %v1234_v21 = vsel %vm1231_vm13, %v1225_v33, -1e+30  ;;  %v1201_v2 = vadd.f32 %v1193_v25, %v1177_v58  ;;  %v1168_v54 = vsel %vm978_vm1, %v1162_v22, %v1163_v18 }
 0x1b0   : > { %v1248_v43 = vrot.slane %v1247_v46, 2  ;;  %v1252_v9 = vrot.slane %v1234_v21, 4  ;;  %v1178_v5 = vadd.f32 %v1168_v54, %v3483_v17  ;;  %v1192_v50 = vsel %vm1084_vm4, %v1186_v44, %v1187_v63  ;;  %v852_v61 = vpop.f32.mrb[36].mxu1 }
 0x1b1   : > { %v1245_v51 = vmax.f32 %v1243_v16, %v1244_v28  ;;  %v1226_v62 = vadd.f32 %v1218_v15, %v1201_v2  ;;  %v1164_v32 = vrot.slane %v852_v61, 1  ;;  %v1157_v0 = vmax.f32 %v1155_v4, %v1156_v29  ;;  %v3642_v35 = vpop.f32.mrb[37].mxu1 }
 0x1b2   : > { %v1249_v8 = vmax.f32 %v1247_v46, %v1248_v43  ;;  %v1253_v7 = vmax.f32 %v1234_v21, %v1252_v9  ;;  %v1202_v25 = vadd.f32 %v1192_v50, %v1178_v5  ;;  %v1321_v22 = vsel %vm1300_vm7, %v3562_v10, %v1320_v53 }
 0x1b3   : > { %v1235_v57 = vsel %vm1231_vm13, %v1226_v62, -1e+30  ;;  %v1167_v17 = vsel %vm978_vm1, %v1163_v18, %v1164_v32  ;;  %v1322_v44 = vsel %vm1302_vm8, %v3584_v12, %v1321_v22  ;;  %v1360_v4 = vadd.f32 %v3372_v39, %v3527_v38 }
 0x1b4   : > { %v1250_v15 = vrot.slane %v1249_v8, 1  ;;  %v1254_v16 = vrot.slane %v1253_v7, 2  ;;  %v1258_v33 = vrot.slane %v1235_v57, 4  ;;  %v1227_v58 = vadd.f32 %v1217_v24, %v1202_v25  ;;  %v858_v6 = vpop.f32.mrb[38].mxu1 }
 0x1b5   : > { %v1179_v46 = vadd.f32 %v1167_v17, %v3497_v23  ;;  %v1323_v10 = vsel %vm1304_vm9, %v3594_v19, %v1322_v44  ;;  %v1363_v29 = vmax.f32 %v1360_v4, 0.0  ;;  %v1188_v53 = vrot.slane %v3642_v35, 2  ;;  %v860_v18 = vpop.f32.mrb[39].mxu1 }
 0x1b6   : > { %v1251_v28 = vmax.f32 %v1249_v8, %v1250_v15  ;;  %v1255_v21 = vmax.f32 %v1253_v7, %v1254_v16  ;;  %v1259_v12 = vmax.f32 %v1235_v57, %v1258_v33  ;;  %v1236_v39 = vsel %vm1231_vm13, %v1227_v58, -1e+30  ;;  %v1515_v57 = vld [vmem:[#allocation7 + $0x4a8] sm:$0xff]  ;;  %v1513_v15 = vld [vmem:[#allocation7 + $0x498] sm:$0xff] }
 0x1b7   : > { %v1264_v38 = vrot.slane %v1236_v39, 4  ;;  %v1324_v2 = vsel %vm1306_vm10, %v1151_v49, %v1323_v10  ;;  %v1191_v24 = vsel %vm1084_vm4, %v1187_v63, %v1188_v53  ;;  %v1212_v23 = vrot.slane %v3597_v37, 3  ;;  %v1517_v16 = vld [vmem:[#allocation7 + $0x4b8] sm:$0xff] }
 0x1b8   : > { %v1335_v19 = vsel %vm1296_vm3, %v1251_v28, %v1245_v51  ;;  %v1256_v54 = vrot.slane %v1255_v21, 1  ;;  %v1260_v43 = vrot.slane %v1259_v12, 2  ;;  %v1325_v9 = vsel %vm1308_vm11, %v1157_v0, %v1324_v2  ;;  %v1523_v2 = vld [vmem:[#allocation7 + $0x4e8] sm:$0xff] }
 0x1b9   : > { %v1265_v5 = vmax.f32 %v1236_v39, %v1264_v38  ;;  %v1361_v50 = vadd.f32 %v3386_v45, %v1325_v9  ;;  %v1203_v61 = vadd.f32 %v1191_v24, %v1179_v46  ;;  %v1215_v49 = vsel %vm1214_vm12, %v1212_v23, %v1213_v13  ;;  %v1510_v46 = vld [vmem:[#allocation7 + $0x480] sm:$0xff] }
 0x1ba   : > { %v1257_v62 = vmax.f32 %v1255_v21, %v1256_v54  ;;  %v1261_v35 = vmax.f32 %v1259_v12, %v1260_v43  ;;  %v1216_v37 = vsel %vm1214_vm12, %v1211_v1, %v1212_v23  ;;  %v1165_v63 = vrot.slane %v858_v6, 1  ;;  %v1514_v21 = vld [vmem:[#allocation7 + $0x4a0] sm:$0xff]  ;;  %v1516_v12 = vld [vmem:[#allocation7 + $0x4b0] sm:$0xff]  ;;  %v1525_v54 = vld [vmem:[#allocation7 + $0x4f8] sm:$0xff] }
 0x1bb   : > { %v1266_v51 = vrot.slane %v1265_v5, 2  ;;  %v1364_v8 = vmax.f32 %v1361_v50, 0.0  ;;  %v1228_v0 = vadd.f32 %v1216_v37, %v1203_v61  ;;  %v1189_v7 = vrot.slane %v860_v18, 2 }
 0x1bc   : > { %v1336_v45 = vsel %vm1298_vm6, %v1257_v62, %v1335_v19  ;;  %v1262_v25 = vrot.slane %v1261_v35, 1  ;;  %v1166_v59 = vsel %vm978_vm1, %v1164_v32, %v1165_v63  ;;  %v3823_v13 = vrot.slane %v3537_v60, 1  ;;  %v1521_v19 = vld [vmem:[#allocation7 + $0x4d8] sm:$0xff]  ;;  %v1520_v62 = vld [vmem:[#allocation7 + $0x4d0] sm:$0xff] }
 0x1bd   : > { %v1267_v17 = vmax.f32 %v1265_v5, %v1266_v51  ;;  %1644 = vmatprep.mubr.f32.mxu1 %v1364_v8  ;;  %1786 = vmatprep.mubr.f32.mxu0 %v1364_v8  ;;  %v1237_v1 = vsel %vm1231_vm13, %v1228_v0, -1e+30  ;;  %v1180_v44 = vadd.f32 %v1166_v59, %v3511_v27  ;;  %v1190_v33 = vsel %vm1084_vm4, %v1188_v53, %v1189_v7  ;;  %v1512_v53 = vld [vmem:[#allocation7 + $0x490] sm:$0xff] }
 0x1be   : > { %v1173_v22 = vsel %vm978_vm1, %v1165_v63, %v3823_v13  ;;  %v1263_v32 = vmax.f32 %v1261_v35, %v1262_v25  ;;  %1645 = vmatmul.mubr.f32.vlgmr.msra.gmra.mrb[40].mxu1 %v1363_v29  ;;  %1787 = vmatmul.mubr.f32.vlgmr.msra.gmra.mrb[32].mxu0 %v1363_v29  ;;  %v1270_v60 = vrot.slane %v1237_v1, 4  ;;  %v3824_v58 = vrot.slane %v3544_v11, 2  ;;  %v1524_v0 = vld [vmem:[#allocation7 + $0x4f0] sm:$0xff] }
 0x1bf   : > { %v1181_v4 = vadd.f32 %v1173_v22, %v3520_v52  ;;  %v1268_v10 = vrot.slane %v1267_v17, 1  ;;  %v3825_v27 = vpack.c.bf16 %v3366_v31, %v3364_v30  ;;  %v3826_v52 = vpack.c.bf16 %v3374_v40, %v3368_v36  ;;  %v1519_v31 = vld [vmem:[#allocation7 + $0x4c8] sm:$0xff] }
 0x1c0   : > { %v1197_v6 = vsel %vm1084_vm4, %v1189_v7, %v3824_v58  ;;  %v1204_v29 = vadd.f32 %v1190_v33, %v1180_v44  ;;  %v2468_v28 = vpack.c.bf16 %v1515_v57, %v1511_v26  ;;  %v1271_v11 = vmax.f32 %v1237_v1, %v1270_v60  ;;  %v1527_v7 = vld [vmem:[#allocation7 + $0x508] sm:$0xff]  ;;  %v1526_v26 = vld [vmem:[#allocation7 + $0x500] sm:$0xff]  ;;  %v1537_v33 = vld [vmem:[#allocation7 + $0x558] sm:$0xff] }
 0x1c1   : > { %2463 = vmatpush1.bf16.msra.mxu1 %v3825_v27  ;;  %2559 = vmatpush1.bf16.msra.mxu0 %v3826_v52  ;;  %v1205_v18 = vadd.f32 %v1197_v6, %v1181_v4  ;;  %v3827_v39 = vpack.c.bf16 %v3378_v42, %v3376_v41  ;;  %v3828_v38 = vpack.c.bf16 %v3392_v48, %v3390_v47  ;;  %v3829_v43 = vmov 0.0   ;;  %v1518_v47 = vld [vmem:[#allocation7 + $0x4c0] sm:$0xff]  ;;  %v1539_v60 = vld [vmem:[#allocation7 + $0x568] sm:$0xff]  ;;  %v1541_v58 = vld [vmem:[#allocation7 + $0x578] sm:$0xff] }
 0x1c2   : > { %v2564_v30 = vpack.c.bf16 %v1517_v16, %v1513_v15  ;;  %v1337_v36 = vsel %vm1300_vm7, %v1263_v32, %v1336_v45  ;;  %v1269_v40 = vmax.f32 %v1267_v17, %v1268_v10  ;;  %v1229_v24 = vadd.f32 %v1215_v49, %v1204_v29  ;;  %1715 = vmatprep.mubr.f32.mxu1 %v3829_v43  ;;  %v1522_v49 = vld [vmem:[#allocation7 + $0x4e0] sm:$0xff]  ;;  %v1531_v45 = vld [vmem:[#allocation7 + $0x528] sm:$0xff]  ;;  %v1528_v15 = vld [vmem:[#allocation7 + $0x510] sm:$0xff] }
 0x1c3   : > { %2465 = vmatprep.subr.bf16.mxu1 %v3827_v39  ;;  %2561 = vmatprep.subr.bf16.mxu0 %v3828_v38  ;;  %v1230_v23 = vadd.f32 %v3625_v3, %v1205_v18  ;;  %v1272_v41 = vrot.slane %v1271_v11, 2  ;;  %v2470_v42 = vpack.c.bf16 %v1514_v21, %v1510_v46  ;;  %v2566_v9 = vpack.c.bf16 %v1516_v12, %v1512_v53  ;;  %v1530_v57 = vld [vmem:[#allocation7 + $0x520] sm:$0xff]  ;;  %v1532_v16 = vld [vmem:[#allocation7 + $0x530] sm:$0xff]  ;;  %v1535_v32 = vld [vmem:[#allocation7 + $0x548] sm:$0xff] }
 0x1c4   : > { %1857 = vmatprep.mubr.f32.mxu0 %v3829_v43  ;;  %v1238_v48 = vsel %vm1231_vm13, %v1229_v24, -1e+30  ;;  %v3830_v50 = vpack.c.bf16 %v3400_v56, %v3398_v55  ;;  %v3831_v3 = vpack.c.bf16 %v3434_v34, %v3432_v20  ;;  %v2472_v61 = vpack.c.bf16 %v1523_v2, %v1519_v31  ;;  %v1529_v55 = vld [vmem:[#allocation7 + $0x518] sm:$0xff]  ;;  %v1534_v29 = vld [vmem:[#allocation7 + $0x540] sm:$0xff]  ;;  %v1540_v39 = vld [vmem:[#allocation7 + $0x570] sm:$0xff] }
 0x1c5   : > { %v1239_v5 = vsel %vm1231_vm13, %v1230_v23, -1e+30  ;;  %v1338_v35 = vsel %vm1302_vm8, %v1269_v40, %v1337_v36  ;;  %v1273_v37 = vmax.f32 %v1271_v11, %v1272_v41  ;;  %v1276_v63 = vrot.slane %v1238_v48, 4  ;;  %v1533_v56 = vld [vmem:[#allocation7 + $0x538] sm:$0xff]  ;;  %v1538_v18 = vld [vmem:[#allocation7 + $0x560] sm:$0xff]  ;;  %v1536_v11 = vld [vmem:[#allocation7 + $0x550] sm:$0xff] }
 0x1c6   : > { %2467 = vmatpush1.bf16.msra.mxu1 %v3830_v50  ;;  %2563 = vmatpush1.bf16.msra.mxu0 %v3831_v3  ;;  %v1282_v51 = vrot.slane %v1239_v5, 4  ;;  %v2568_v8 = vpack.c.bf16 %v1525_v54, %v1521_v19  ;;  %v2474_v34 = vpack.c.bf16 %v1522_v49, %v1518_v47  ;;  %v2570_v13 = vpack.c.bf16 %v1524_v0, %v1520_v62  ;;  %v1543_v38 = vld [vmem:[#allocation7 + $0x588] sm:$0xff]  ;;  %v1545_v31 = vld [vmem:[#allocation7 + $0x598] sm:$0xff]  ;;  %v1542_v54 = vld [vmem:[#allocation7 + $0x580] sm:$0xff] }
 0x1c7   : > { %2469 = vmatprep.subr.bf16.mxu1 %v2468_v28  ;;  %2565 = vmatprep.subr.bf16.mxu0 %v2564_v30  ;;  %v1274_v25 = vrot.slane %v1273_v37, 1  ;;  %v1277_v59 = vmax.f32 %v1238_v48, %v1276_v63  ;;  %v2476_v22 = vpack.c.bf16 %v1531_v45, %v1527_v7  ;;  %v2572_v4 = vpack.c.bf16 %v1533_v56, %v1529_v55  ;;  %v1547_v30 = vld [vmem:[#allocation7 + $0x5a8] sm:$0xff]  ;;  %v1549_v2 = vld [vmem:[#allocation7 + $0x5b8] sm:$0xff]  ;;  %v1546_v43 = vld [vmem:[#allocation7 + $0x5a0] sm:$0xff] }
 0x1c8   : > { %v1283_v20 = vmax.f32 %v1239_v5, %v1282_v51  ;;  %v2478_v27 = vpack.c.bf16 %v1530_v57, %v1526_v26  ;;  %v2574_v52 = vpack.c.bf16 %v1532_v16, %v1528_v15  ;;  %v2480_v53 = vpack.c.bf16 %v1539_v60, %v1535_v32  ;;  %v1548_v47 = vld [vmem:[#allocation7 + $0x5b0] sm:$0xff]  ;;  %v1551_v48 = vld [vmem:[#allocation7 + $0x5c8] sm:$0xff]  ;;  %v1553_v3 = vld [vmem:[#allocation7 + $0x5d8] sm:$0xff] }
 0x1c9   : > { %v1275_v17 = vmax.f32 %v1273_v37, %v1274_v25  ;;  %v1278_v1 = vrot.slane %v1277_v59, 2  ;;  %v2576_v12 = vpack.c.bf16 %v1541_v58, %v1537_v33  ;;  %v1355_v24 = vsub.s32 2, %v3345_v14  ;;  %v1555_v50 = vld [vmem:[#allocation7 + $0x5e8] sm:$0xff]  ;;  %v2748_v62 = vld [vmem:[%s3792_s2] sm:$0x7]  ;;  %v1552_v45 = vld [vmem:[#allocation7 + $0x5d0] sm:$0xff] }
 0x1ca   : > { %2471 = vmatpush1.bf16.msra.mxu1 %v2470_v42  ;;  %2567 = vmatpush1.bf16.msra.mxu0 %v2566_v9  ;;  %v1284_v44 = vrot.slane %v1283_v20, 2  ;;  %v2482_v23 = vpack.c.bf16 %v1538_v18, %v1534_v29  ;;  %v2578_v19 = vpack.c.bf16 %v1540_v39, %v1536_v11  ;;  %v2484_v41 = vpack.c.bf16 %v1547_v30, %v1543_v38  ;;  %v1544_v9 = vld [vmem:[#allocation7 + $0x590] sm:$0xff]  ;;  %v1550_v51 = vld [vmem:[#allocation7 + $0x5c0] sm:$0xff]  ;;  %v1885_v25 = vld [vmem:[#allocation8 + $0x88] sm:$0xff] }
 0x1cb   : > { %2473 = vmatprep.subr.bf16.mxu1 %v2472_v61  ;;  %2569 = vmatprep.subr.bf16.mxu0 %v2568_v8  ;;  %v1279_v6 = vmax.f32 %v1277_v59, %v1278_v1  ;;  %v1339_v10 = vsel %vm1304_vm9, %v1275_v17, %v1338_v35  ;;  %v2580_v42 = vpack.c.bf16 %v1549_v2, %v1545_v31  ;;  %v1557_v61 = vld [vmem:[#allocation7 + $0x5f8] sm:$0xff]  ;;  %v1554_v8 = vld [vmem:[#allocation7 + $0x5e0] sm:$0xff]  ;;  %v1556_v55 = vld [vmem:[#allocation7 + $0x5f0] sm:$0xff] }
 0x1cc   : > { %v1285_v46 = vmax.f32 %v1283_v20, %v1284_v44  ;;  %v1356_v35 = vrot.slane %v2748_v62, %v1355_v24  ;;  %v2486_v37 = vpack.c.bf16 %v1546_v43, %v1542_v54  ;;  %v2582_v63 = vpack.c.bf16 %v1548_v47, %v1544_v9  ;;  %v1884_v56 = vld [vmem:[#allocation8 + $0x80] sm:$0xff]  ;;  %v1917_v20 = vld [vmem:[#allocation8 + $0x188] sm:$0xff]  ;;  %v1886_v15 = vld [vmem:[#allocation8 + $0x90] sm:$0xff] }
 0x1cd   : > { %v1280_v28 = vrot.slane %v1279_v6, 1  ;;  %v2488_v0 = vpack.c.bf16 %v1555_v50, %v1551_v48  ;;  %v2584_v7 = vpack.c.bf16 %v1557_v61, %v1553_v3  ;;  %v1916_v59 = vld [vmem:[#allocation8 + $0x180] sm:$0xff]  ;;  %v1869_v57 = vld [vmem:[#allocation8 + $0x8] sm:$0xff]  ;;  %v2588_v17 = vpack.c.bf16 %v1885_v25, %v1884_v56  ;;  %v1887_v16 = vld [vmem:[#allocation8 + $0x98] sm:$0xff] }
 0x1ce   : > { %2475 = vmatpush1.bf16.msra.mxu1 %v2474_v34  ;;  %2571 = vmatpush1.bf16.msra.mxu0 %v2570_v13  ;;  %v1286_v21 = vrot.slane %v1285_v46, 1  ;;  %v2490_v13 = vpack.c.bf16 %v1554_v8, %v1550_v51  ;;  %v1868_v26 = vld [vmem:[#allocation8] sm:$0xff]  ;;  %v2620_v1 = vpack.c.bf16 %v1917_v20, %v1916_v59  ;;  %v1918_v32 = vld [vmem:[#allocation8 + $0x190] sm:$0xff]  ;;  %v1919_v60 = vld [vmem:[#allocation8 + $0x198] sm:$0xff] }
 0x1cf   : > { %2477 = vmatprep.subr.bf16.mxu1 %v2476_v22  ;;  %2573 = vmatprep.subr.bf16.mxu0 %v2572_v4  ;;  %v1281_v36 = vmax.f32 %v1279_v6, %v1280_v28  ;;  %v2586_v22 = vpack.c.bf16 %v1556_v55, %v1552_v45  ;;  %v1900_v44 = vld [vmem:[#allocation8 + $0x100] sm:$0xff]  ;;  %v1901_v4 = vld [vmem:[#allocation8 + $0x108] sm:$0xff]  ;;  %v2590_v58 = vpack.c.bf16 %v1869_v57, %v1868_v26  ;;  %v1902_v29 = vld [vmem:[#allocation8 + $0x110] sm:$0xff] }
 0x1d0   : > { %v1287_v40 = vmax.f32 %v1285_v46, %v1286_v21  ;;  %v2622_v6 = vpack.c.bf16 %v1901_v4, %v1900_v44  ;;  %v1870_v46 = vld [vmem:[#allocation8 + $0x10] sm:$0xff]  ;;  %v1903_v18 = vld [vmem:[#allocation8 + $0x118] sm:$0xff]  ;;  %v1888_v28 = vld [vmem:[#allocation8 + $0xa0] sm:$0xff] }
 0x1d1   : > { %v1340_v5 = vsel %vm1306_vm10, %v1281_v36, %v1339_v10  ;;  %v1871_v10 = vld [vmem:[#allocation8 + $0x18] sm:$0xff]  ;;  %v1889_v21 = vld [vmem:[#allocation8 + $0xa8] sm:$0xff]  ;;  %v2626_v39 = vpack.c.bf16 %v1903_v18, %v1902_v29  ;;  %v1872_v38 = vld [vmem:[#allocation8 + $0x20] sm:$0xff] }
 0x1d2   : > { %2479 = vmatpush1.bf16.msra.mxu1 %v2478_v27  ;;  %2575 = vmatpush1.bf16.msra.mxu0 %v2574_v52  ;;  %v1341_v49 = vsel %vm1308_vm11, %v1287_v40, %v1340_v5  ;;  %v2592_v27 = vpack.c.bf16 %v1887_v16, %v1886_v15  ;;  %v2624_v52 = vpack.c.bf16 %v1919_v60, %v1918_v32  ;;  %v1873_v30 = vld [vmem:[#allocation8 + $0x28] sm:$0xff]  ;;  %v1904_v36 = vld [vmem:[#allocation8 + $0x120] sm:$0xff]  ;;  %v1922_v54 = vld [vmem:[#allocation8 + $0x1b0] sm:$0xff] }
 0x1d3   : > { %2481 = vmatprep.subr.bf16.mxu1 %v2480_v53  ;;  %2577 = vmatprep.subr.bf16.mxu0 %v2576_v12  ;;  %v1362_v34 = vadd.f32 %v1356_v35, %v1341_v49  ;;  %v1920_v53 = vld [vmem:[#allocation8 + $0x1a0] sm:$0xff]  ;;  %v1921_v12 = vld [vmem:[#allocation8 + $0x1a8] sm:$0xff]  ;;  %v2594_v11 = vpack.c.bf16 %v1871_v10, %v1870_v46  ;;  %v2596_v31 = vpack.c.bf16 %v1889_v21, %v1888_v28  ;;  %v1923_v43 = vld [vmem:[#allocation8 + $0x1b8] sm:$0xff] }
 0x1d4   : > { %v2628_v2 = vpack.c.bf16 %v1921_v12, %v1920_v53  ;;  %v1905_v40 = vld [vmem:[#allocation8 + $0x128] sm:$0xff]  ;;  %v1874_v9 = vld [vmem:[#allocation8 + $0x30] sm:$0xff]  ;;  %v1875_v47 = vld [vmem:[#allocation8 + $0x38] sm:$0xff]  ;;  %v2632_v5 = vpack.c.bf16 %v1923_v43, %v1922_v54  ;;  %v3832_v54 = vsub.s32 0, %v3345_v14 }
 0x1d5   : > { %v1365_v33 = vmax.f32 %v1362_v34, 0.0  ;;  %v1906_v50 = vld [vmem:[#allocation8 + $0x130] sm:$0xff]  ;;  %v1907_v3 = vld [vmem:[#allocation8 + $0x138] sm:$0xff]  ;;  %v1892_v61 = vld [vmem:[#allocation8 + $0xc0] sm:$0xff] }
 0x1d6   : > { %2483 = vmatpush1.bf16.msra.mxu1 %v2482_v23  ;;  %2579 = vmatpush1.bf16.msra.mxu0 %v2578_v19  ;;  %v1890_v23 = vld [vmem:[#allocation8 + $0xb0] sm:$0xff]  ;;  %v1891_v19 = vld [vmem:[#allocation8 + $0xb8] sm:$0xff]  ;;  %v1893_v49 = vld [vmem:[#allocation8 + $0xc8] sm:$0xff] }
 0x1d7   : > { %2485 = vmatprep.subr.bf16.mxu1 %v2484_v41  ;;  %2581 = vmatprep.subr.bf16.mxu0 %v2580_v42  ;;  %v2598_v41 = vpack.c.bf16 %v1873_v30, %v1872_v38  ;;  %v2630_v42 = vpack.c.bf16 %v1905_v40, %v1904_v36  ;;  %v2600_v48 = vpack.c.bf16 %v1891_v19, %v1890_v23  ;;  %v1924_v62 = vld [vmem:[#allocation8 + $0x1c0] sm:$0xff]  ;;  %v1925_v35 = vld [vmem:[#allocation8 + $0x1c8] sm:$0xff]  ;;  %v1894_v56 = vld [vmem:[#allocation8 + $0xd0] sm:$0xff]  ;;  %v1574_v19 = vsub.s32 3, %v3345_v14 }
 0x1d8   : > { %v1876_v51 = vld [vmem:[#allocation8 + $0x40] sm:$0xff]  ;;  %v1877_v8 = vld [vmem:[#allocation8 + $0x48] sm:$0xff]  ;;  %v1895_v25 = vld [vmem:[#allocation8 + $0xd8] sm:$0xff] }
 0x1d9   : > { %v1908_v45 = vld [vmem:[#allocation8 + $0x140] sm:$0xff]  ;;  %v1909_v55 = vld [vmem:[#allocation8 + $0x148] sm:$0xff]  ;;  %v1926_v59 = vld [vmem:[#allocation8 + $0x1d0] sm:$0xff]  ;;  %v2606_v34 = vpack.c.bf16 %v1877_v8, %v1876_v51  ;;  %v2608_v57 = vpack.c.bf16 %v1895_v25, %v1894_v56 }
 0x1da   : > { %2487 = vmatpush1.bf16.msra.mxu1 %v2486_v37  ;;  %2583 = vmatpush1.bf16.msra.mxu0 %v2582_v63  ;;  %v2602_v37 = vpack.c.bf16 %v1875_v47, %v1874_v9  ;;  %v2634_v63 = vpack.c.bf16 %v1907_v3, %v1906_v50  ;;  %v1927_v20 = vld [vmem:[#allocation8 + $0x1d8] sm:$0xff]  ;;  %v1896_v4 = vld [vmem:[#allocation8 + $0xe0] sm:$0xff]  ;;  %v1897_v15 = vld [vmem:[#allocation8 + $0xe8] sm:$0xff] }
 0x1db   : > { %2489 = vmatprep.subr.bf16.mxu1 %v2488_v0  ;;  %2585 = vmatprep.subr.bf16.mxu0 %v2584_v7  ;;  %v2604_v0 = vpack.c.bf16 %v1893_v49, %v1892_v61  ;;  %v2636_v7 = vpack.c.bf16 %v1925_v35, %v1924_v62  ;;  %v1879_v26 = vld [vmem:[#allocation8 + $0x58] sm:$0xff]  ;;  %v1928_v16 = vld [vmem:[#allocation8 + $0x1e0] sm:$0xff]  ;;  %v1929_v32 = vld [vmem:[#allocation8 + $0x1e8] sm:$0xff] }
 0x1dc   : > { %v1911_v44 = vld [vmem:[#allocation8 + $0x158] sm:$0xff]  ;;  %v1880_v46 = vld [vmem:[#allocation8 + $0x60] sm:$0xff]  ;;  %v1881_v10 = vld [vmem:[#allocation8 + $0x68] sm:$0xff] }
 0x1dd   : > { %v1913_v29 = vld [vmem:[#allocation8 + $0x168] sm:$0xff]  ;;  %v1898_v18 = vld [vmem:[#allocation8 + $0xf0] sm:$0xff]  ;;  %v1899_v28 = vld [vmem:[#allocation8 + $0xf8] sm:$0xff] }
 0x1de   : > { %2491 = vmatpush1.bf16.msra.mxu1 %v2490_v13  ;;  %2587 = vmatpush1.bf16.msra.mxu0 %v2586_v22  ;;  %v2638_v13 = vpack.c.bf16 %v1909_v55, %v1908_v45  ;;  %v1878_v22 = vld [vmem:[#allocation8 + $0x50] sm:$0xff]  ;;  %v2616_v53 = vpack.c.bf16 %v1899_v28, %v1898_v18  ;;  %v1883_v30 = vld [vmem:[#allocation8 + $0x78] sm:$0xff]  ;;  %v1558_v23 = vld [vmem:[%s3794_s4] sm:$0xf] }
 0x1df   : > { %2589 = vmatprep.subr.bf16.mxu1 %v2588_v17  ;;  %2621 = vmatprep.subr.bf16.mxu0 %v2620_v1  ;;  %v2640_v17 = vpack.c.bf16 %v1927_v20, %v1926_v59  ;;  %v1910_v1 = vld [vmem:[#allocation8 + $0x150] sm:$0xff]  ;;  %v2610_v60 = vpack.c.bf16 %v1879_v26, %v1878_v22  ;;  %v1563_v43 = vrot.slane %v1558_v23, %v3832_v54 }
 0x1e0   : > { %v1930_v12 = vld [vmem:[#allocation8 + $0x1f0] sm:$0xff]  ;;  %v1575_v47 = vrot.slane %v1558_v23, %v1574_v19 }
 0x1e1   : > { %1716 = vmatmul.mubr.f32.vlgmr.msra.gmra.mrb[40].mxu1 %v1365_v33  ;;  %1858 = vmatmul.mubr.f32.vlgmr.msra.gmra.mrb[32].mxu0 %v1365_v33  ;;  %v2642_v33 = vpack.c.bf16 %v1911_v44, %v1910_v1 }
 0x1e2   : > { %2591 = vmatpush3.bf16.msra.mxu1 %v2590_v58  ;;  %2623 = vmatpush3.bf16.msra.mxu0 %v2622_v6  ;;  %v2612_v58 = vpack.c.bf16 %v1897_v15, %v1896_v4  ;;  %v2644_v6 = vpack.c.bf16 %v1929_v32, %v1928_v16 }
 0x1e3   : > { %2593 = vmatprep.subr.bf16.mxu1 %v2592_v27  ;;  %2625 = vmatprep.subr.bf16.mxu0 %v2624_v52  ;;  %v1912_v27 = vld [vmem:[#allocation8 + $0x160] sm:$0xff]  ;;  %v2614_v52 = vpack.c.bf16 %v1881_v10, %v1880_v46 }
 0x1e4   : > { %v2646_v21 = vpack.c.bf16 %v1913_v29, %v1912_v27 }
 0x1e6   : > { %2595 = vmatpush3.bf16.msra.mxu1 %v2594_v11  ;;  %2627 = vmatpush3.bf16.msra.mxu0 %v2626_v39  ;;  %v1931_v11 = vld [vmem:[#allocation8 + $0x1f8] sm:$0xff]  ;;  %v1882_v39 = vld [vmem:[#allocation8 + $0x70] sm:$0xff] }
 0x1e7   : > { %2597 = vmatprep.subr.bf16.mxu1 %v2596_v31  ;;  %2629 = vmatprep.subr.bf16.mxu0 %v2628_v2  ;;  %v2648_v38 = vpack.c.bf16 %v1931_v11, %v1930_v12  ;;  %v1914_v31 = vld [vmem:[#allocation8 + $0x170] sm:$0xff]  ;;  %v1915_v2 = vld [vmem:[#allocation8 + $0x178] sm:$0xff]  ;;  %v2618_v36 = vpack.c.bf16 %v1883_v30, %v1882_v39 }
 0x1e8   : > { %v2650_v40 = vpack.c.bf16 %v1915_v2, %v1914_v31 }
 0x1ea   : > { %2599 = vmatpush3.bf16.msra.mxu1 %v2598_v41  ;;  %2631 = vmatpush3.bf16.msra.mxu0 %v2630_v42  ;;  %v1571_v41 = vrot.slane %v1558_v23, %v1355_v24  ;;  %v3833_v42 = vsub.s32 1, %v3345_v14 }
 0x1eb   : > { %2601 = vmatprep.subr.bf16.mxu1 %v2600_v48  ;;  %2633 = vmatprep.subr.bf16.mxu0 %v2632_v5 }
 0x1ec   : > { %v1567_v9 = vrot.slane %v1558_v23, %v3833_v42 }
 0x1ee   : > { %2603 = vmatpush3.bf16.msra.mxu1 %v2602_v37  ;;  %2635 = vmatpush3.bf16.msra.mxu0 %v2634_v63 }
 0x1ef   : > { %2605 = vmatprep.subr.bf16.mxu1 %v2604_v0  ;;  %2637 = vmatprep.subr.bf16.mxu0 %v2636_v7  ;;  %v2248_v0 = vld [vmem:[%s3796_s6] ss:$0 sm:$0xff] }
 0x1f2   : > { %2607 = vmatpush3.bf16.msra.mxu1 %v2606_v34  ;;  %2639 = vmatpush3.bf16.msra.mxu0 %v2638_v13 }
 0x1f3   : > { %2609 = vmatprep.subr.bf16.mxu1 %v2608_v57  ;;  %2641 = vmatprep.subr.bf16.mxu0 %v2640_v17 }
 0x1f6   : > { %2611 = vmatpush3.bf16.msra.mxu1 %v2610_v60  ;;  %2643 = vmatpush3.bf16.msra.mxu0 %v2642_v33 }
 0x1f7   : > { %2613 = vmatprep.subr.bf16.mxu1 %v2612_v58  ;;  %2645 = vmatprep.subr.bf16.mxu0 %v2644_v6 }
 0x1fa   : > { %2615 = vmatpush3.bf16.msra.mxu1 %v2614_v52  ;;  %2647 = vmatpush3.bf16.msra.mxu0 %v2646_v21 }
 0x1fb   : > { %2617 = vmatprep.subr.bf16.mxu1 %v2616_v53  ;;  %2649 = vmatprep.subr.bf16.mxu0 %v2648_v38 }
 0x1fe   : > { %2619 = vmatpush3.bf16.msra.mxu1 %v2618_v36  ;;  %2651 = vmatpush3.bf16.msra.mxu0 %v2650_v40 }
 0x2b4   : > { %v1717_v48 = vpop.f32.mrb[40].mxu1  ;;  %v1859_v5 = vpop.f32.mrb[32].mxu0 }
 0x2b5   : > { %v2656_v50 = vadd.f32 %v1717_v48, %v1563_v43  ;;  %v2658_v3 = vadd.f32 %v1859_v5, %v1571_v41  ;;  %v1719_v61 = vpop.f32.mrb[41].mxu1  ;;  %v1861_v49 = vpop.f32.mrb[33].mxu0 }
 0x2b6   : > { %v2657_v62 = vadd.f32 %v1719_v61, %v1567_v9  ;;  %v2659_v35 = vadd.f32 %v1861_v49, %v1575_v47 }
 0x2b7   : > { %v1864_v51 = vmax.f32 %v2656_v50, 0.0  ;;  %v1866_v8 = vmax.f32 %v2658_v3, 0.0 }
 0x2b8   : > { %v1865_v37 = vmax.f32 %v2657_v62, 0.0  ;;  %v1867_v63 = vmax.f32 %v2659_v35, 0.0 }
 0x2ba   : > { %2003 = vmatprep.mubr.f32.mxu1 %v1865_v37  ;;  %2073 = vmatprep.mubr.f32.mxu0 %v1867_v63 }
 0x2bb   : > { %2004 = vmatmul.mubr.f32.vlgmr.msra.gmra.mrb[42].mxu1 %v1864_v51  ;;  %2074 = vmatmul.mubr.f32.vlgmr.msra.gmra.mrb[34].mxu0 %v1866_v8 }
 0x38e   : > { %v2298_v14 = vpop.f32.mrb[42].mxu1  ;;  %v2333_v24 = vpop.f32.mrb[34].mxu0 }
 0x38f   : > { %v2299_v7 = vpop.f32.mrb[43].mxu1  ;;  %v2334_v45 = vpop.f32.mrb[35].mxu0 }
 0x390   : > { %v2300_v55 = vadd.f32 %v2299_v7, %v2298_v14  ;;  %v2335_v56 = vadd.f32 %v2334_v45, %v2333_v24 }
 0x392   : > { %v2006_v25 = vadd.f32 %v2300_v55, %v2248_v0 }
 0x394   : > { %v2076_v59 = vadd.f32 %v2335_v56, %v2006_v25 }
 0x396   : > { %2079 = vst [vmem:[%s340_s23] sm:$0xff] %v2076_v59 }
 0x397   : > { %2876 = shalt.err (!%p2873_p4)
}
 0x398   : > { %s2877_s16 = scalar_lea.hbm %s3746_s30, 128  ;;  %s2881_s15 = scalar_lea.hbm %s3797_s7, 256 }
 0x399   : > { %p2878_p9 = scmp.ne.s32.totalorder %s3746_s30, %s2877_s16  ;;  %p2882_p8 = scmp.lt.u32.totalorder %s3746_s30, %s3797_s7 }
 0x39a   : > { %p2883_p13 = scmp.lt.u32.totalorder %s2881_s15, %s2877_s16  ;;  %p2885_p10 = scmp.lt.u32.totalorder %s2877_s16, %s3746_s30 }
 0x39b   : > { %p2879_p0 = pnand %p2878_p9, %p3136_p5 }
 0x39c   : > { %p2884_p6 = por %p2883_p13, %p2882_p8 }
 0x39d   : > { %p2880_p11 = pneg %p2879_p0 }
 0x39e   : > { %p2886_p3 = por %p2885_p10, %p2884_p6 }
 0x3a0   : > { %p2887_p7 = pnand %p2886_p3, %p2880_p11 }
 0x3a2   : > { %2890 = shalt.err (!%p2887_p7)
}
 0x3a3   : > { %2678 = dma.vmem_to_hbm [thread:$0]  (%p3136_p5), %s3748_s22, 128, %s3746_s30, %s2081_s9  }
 0x3a4 PF: > { %s2106_s23 = sand.u32 1, %s2925_s24   ;;  %p3834_p12 = scmp.ne.s32.totalorder %s3809_s8, 0 }
 0x3a5   : > { %p3835_p2 = scmp.ge.s32.totalorder %s2937_s27, 2  ;;  %s2107_s14 = scalar_lea.sflag [#allocation4], %s2106_s23 }
 0x3a7   : > { %p2695_p1 = pnand %p3835_p2, %p3834_p12 }
 0x3a9   : > { %2920 = dma.done.wait (!%p2695_p1), %s2107_s14, 128  }
 0x3aa   : > { %2922 = vsyncadd (!%p2695_p1), %s2107_s14, 4294967168  ;;  %p22_p4 = scmp.ge.s32.totalorder %s3122_s13, 4   ;;  %s3836_s24 = smov %s2929_s25 }
 0x3ab   : > { %s3837_s25 = smov %s2933_s26  ;;  %s3838_s26 = smov %s3132_s18 }
 0x3ac   : > { %s3839_s27 = smov %s3122_s13  ;;  %24 = sbr.rel (!%p22_p4) target bundleno = 9 (0x9), region = 105 }
 0x3b3   :  { %2112 = vsyncpa [#allocation3], 1 }
 0x3b4   :  { %2114 = vsyncpa [#allocation3 + $0x1], 1 }
 0x3b5   :  { %2115 = vsyncpa [#allocation6], 1 }
 0x3b6   :  { %2116 = vsyncpa [#allocation9], 1 }
 0x3b7   :  { %2117 = vsyncpa [#allocation4], 1 }
 0x3b8   :  { %2119 = vsyncpa [#allocation4 + $0x1], 1 }

</bundles_post_ra>
